<compile_context>
chip_gen: v6e
topology: v6e:2x2x1
jax: 0.10.0
libtpu: 0.0.40
codegen_flags: <defaults>
</compile_context>

<pallas_src>
import functools

import jax
import jax.numpy as jnp
from jax.experimental import pallas as pl
from jax.experimental.pallas import tpu as pltpu


def _flow_block_kernel(half, x_ref, h_ref, Wp_ref, bp_ref, w1_ref, b1_ref,
                       w2_ref, b2_ref, z_ref, lds_ref, zah_ref):
    """Runs `shift` consecutive flows (same channel count C) on one lane slab.

    Grid: (n_par, shift) = (lane-parallel chunks, flow index).  The z output
    block is resident in VMEM across the flow axis (same block index), so the
    activation never round-trips through HBM between flows of the same block.

    x_ref:   (C, BKp) f32     initial activation slab (read only at flow 0)
    h_ref:   (F, BKp) bf16    history conditioning slab (read only at flow 0)
    Wp_ref:  (C, C)  bf16     fused ActNorm+1x1-conv weight for this flow
    bp_ref:  (C, 1)  f32      fused bias (W @ actnorm_bias)
    w1_ref:  (H, half+F) bf16 coupling first layer acting on [za ; h]
    b1_ref:  (H, 1)  f32
    w2_ref:  (C, H)  bf16     coupling second layer -> (log_s, t)
    b2_ref:  (C, 1)  f32
    z_ref:   (C, BKp) f32     running activation / final output (VMEM-resident)
    lds_ref: (1, BKp) f32     per-lane sum of log_s, accumulated over flows
    zah_ref: (half+F, BKp) bf16 scratch staging the stacked coupling input
    """
    f = pl.program_id(1)

    @pl.when(f == 0)
    def _():
        z_ref[...] = x_ref[...]
        lds_ref[...] = jnp.zeros_like(lds_ref)
        # History half of the coupling input does not change across flows of
        # this block: stage it once.
        zah_ref[half:, :] = h_ref[...]

    # --- fused ActNorm + invertible 1x1 conv:  y = (W @ diag(exp(logs))) @ z + W @ b ---
    y = (jnp.dot(Wp_ref[...], z_ref[...].astype(jnp.bfloat16),
                 preferred_element_type=jnp.float32)
         + bp_ref[...])                                     # (C, BKp) f32

    za = y[:half, :]                                        # (half, BKp)
    zb = y[half:, :]                                        # (half, BKp)

    # --- affine coupling: single fused first-layer matmul over [za ; h] ---
    zah_ref[:half, :] = za.astype(jnp.bfloat16)
    hid = jnp.tanh(jnp.dot(w1_ref[...], zah_ref[...],
                           preferred_element_type=jnp.float32)
                   + b1_ref[...])                           # (H, BKp) f32
    out = (jnp.dot(w2_ref[...], hid.astype(jnp.bfloat16),
                   preferred_element_type=jnp.float32)
           + b2_ref[...])                                   # (C, BKp) f32
    log_s = out[:half, :]
    t = out[half:, :]

    # elementwise path stays f32 (VPU/EUP friendly on all generations)
    z_ref[:half, :] = za
    z_ref[half:, :] = zb * jnp.exp(log_s) + t

    # in-kernel reduction of log_s over channels, accumulated over flows
    lds_ref[...] += jnp.sum(log_s, axis=0, keepdims=True)


def flow_block(x, h, bp):
    """Run one block of `shift` flows (constant channel count) in one pallas_call."""
    C, BK = x.shape
    F = h.shape[0]
    shift = bp["Wp"].shape[0]
    H = bp["w1"].shape[1]
    half = C // 2
    assert C % 2 == 0, "channel count per block must be even"

    # Give v7x's two TensorCores work at realistic sizes while keeping a single
    # lane-dense slab at toy sizes (lane-dense stores are the bigger lever).
    n_par = 2 if (BK % 256 == 0) else 1
    BKp = BK // n_par

    kernel = functools.partial(_flow_block_kernel, half)

    z, lds = pl.pallas_call(
        kernel,
        out_shape=(jax.ShapeDtypeStruct((C, BK), jnp.float32),
                   jax.ShapeDtypeStruct((1, BK), jnp.float32)),
        grid=(n_par, shift),
        in_specs=[
            pl.BlockSpec((C, BKp), lambda p, f: (0, p)),                # x
            pl.BlockSpec((F, BKp), lambda p, f: (0, p)),                # history
            pl.BlockSpec((None, C, C), lambda p, f: (f, 0, 0)),         # Wp (bf16)
            pl.BlockSpec((None, C, 1), lambda p, f: (f, 0, 0)),         # bp
            pl.BlockSpec((None, H, half + F), lambda p, f: (f, 0, 0)),  # w1 (bf16)
            pl.BlockSpec((None, H, 1), lambda p, f: (f, 0, 0)),         # b1
            pl.BlockSpec((None, C, H), lambda p, f: (f, 0, 0)),         # w2 (bf16)
            pl.BlockSpec((None, C, 1), lambda p, f: (f, 0, 0)),         # b2
        ],
        out_specs=(
            pl.BlockSpec((C, BKp), lambda p, f: (0, p)),
            pl.BlockSpec((1, BKp), lambda p, f: (0, p)),
        ),
        scratch_shapes=[pltpu.VMEM((half + F, BKp), jnp.bfloat16)],
        compiler_params=pltpu.CompilerParams(
            dimension_semantics=("parallel", "arbitrary")),
    )(x, h, bp["Wp"], bp["bp"], bp["w1"], bp["b1"], bp["w2"], bp["b2"])

    return z, jnp.sum(lds)


def init_params(key, feats_hidden, blocks, flows, coupling_hidden=32):
    """Deterministic synthetic parameters matching the module's per-flow shapes."""
    feats_base = feats_hidden // blocks
    shift = flows // blocks
    params = []
    feats_block = feats_hidden
    for i in range(flows):
        if i % shift == 0 and i > 0:
            feats_block -= feats_base
        C = feats_block
        half = C // 2
        key, *ks = jax.random.split(key, 9)
        # orthogonal init for the invertible 1x1 conv (finite log|det W|)
        Q, _ = jnp.linalg.qr(jax.random.normal(ks[0], (C, C), jnp.float32))
        params.append(dict(
            logs=0.05 * jax.random.normal(ks[1], (C, 1), jnp.float32),
            bias=0.10 * jax.random.normal(ks[2], (C, 1), jnp.float32),
            W=Q.astype(jnp.float32),
            w1a=0.10 * jax.random.normal(ks[3], (coupling_hidden, half), jnp.float32),
            w1h=0.10 * jax.random.normal(ks[4], (coupling_hidden, feats_hidden), jnp.float32),
            b1=0.05 * jax.random.normal(ks[5], (coupling_hidden, 1), jnp.float32),
            w2=0.05 * jax.random.normal(ks[6], (C, coupling_hidden), jnp.float32),
            b2=0.02 * jax.random.normal(ks[7], (C, 1), jnp.float32),
        ))
    return params


def prepare_params(raw_params, *, feats_hidden, blocks, flows, K, K_div):
    """One-time prep: fold ActNorm into the 1x1 conv, merge coupling first-layer
    weights, stack per-block, cast MXU operands to bf16, and precompute the
    parameter-only log-determinant terms (hoisted out of the per-forward loop)."""
    feats_base = feats_hidden // blocks
    shift = flows // blocks
    block_params = []
    param_logdet = jnp.zeros((), jnp.float32)
    idx = 0
    C = feats_hidden
    for b in range(blocks):
        if b > 0:
            C -= feats_base
        Wp_l, bp_l, w1_l, b1_l, w2_l, b2_l = [], [], [], [], [], []
        for _ in range(shift):
            p = raw_params[idx]
            idx += 1
            scale = jnp.exp(p["logs"])                    # (C, 1)
            Wp = p["W"] * scale.T                         # W @ diag(exp(logs))
            bpv = p["W"] @ p["bias"]                      # W @ bias
            w1 = jnp.concatenate([p["w1a"], p["w1h"]], axis=1)  # (H, half + F)
            _, logabsdet = jnp.linalg.slogdet(p["W"])
            param_logdet = param_logdet + (K * jnp.sum(p["logs"]) / K_div
                                           + K * logabsdet)
            Wp_l.append(Wp)
            bp_l.append(bpv)
            w1_l.append(w1)
            b1_l.append(p["b1"])
            w2_l.append(p["w2"])
            b2_l.append(p["b2"])
        block_params.append(dict(
            Wp=jnp.stack(Wp_l).astype(jnp.bfloat16),
            bp=jnp.stack(bp_l).astype(jnp.float32),
            w1=jnp.stack(w1_l).astype(jnp.bfloat16),
            b1=jnp.stack(b1_l).astype(jnp.float32),
            w2=jnp.stack(w2_l).astype(jnp.bfloat16),
            b2=jnp.stack(b2_l).astype(jnp.float32),
        ))
    return dict(blocks=block_params, param_logdet=param_logdet)


def flow_aff_conv_act_forward(future_enc, history_enc, prepared, *,
                              feats_hidden, blocks, flows, K_div):
    """Mirrors Flow_aff_conv_act.forward. Returns (Z, log_det)."""
    del flows, K_div  # already baked into `prepared`
    B, _, K = future_enc.shape
    feats_base = feats_hidden // blocks
    BK = B * K

    # (B, C, K) -> lane-dense (C, B*K) slab and back
    def to_slab(a):
        return jnp.transpose(a, (1, 0, 2)).reshape(a.shape[1], BK)

    def from_slab(s, C):
        return jnp.transpose(s.reshape(C, B, K), (1, 0, 2))

    # note: the PyTorch forward draws z_his = randn(B, F, K) but never uses it — skipped.
    x = to_slab(future_enc)                                   # f32 (C, B*K)
    h = to_slab(history_enc).astype(jnp.bfloat16)             # MXU operand only
    log_det = prepared["param_logdet"]                        # hoisted param-only terms

    output_slabs = []
    for b in range(blocks):
        if b > 0:
            output_slabs.append(x[:feats_base, :])
            x = x[feats_base:, :]
        x, log_det_a = flow_block(x, h, prepared["blocks"][b])
        log_det = log_det + log_det_a
    output_slabs.append(x)

    Z = from_slab(jnp.concatenate(output_slabs, axis=0), feats_hidden)
    return Z, jnp.reshape(log_det, (1,))


if __name__ == "__main__":
    # small, module-consistent shapes
    B = 2
    feats_hidden = 32
    K = 16              # sequence length; also args.K used for the /K normalisation
    blocks = 4
    flows = 8           # shift = flows // blocks = 2, feats_base = 8

    key = jax.random.PRNGKey(0)
    k1, k2, k3 = jax.random.split(key, 3)
    future_enc = jax.random.normal(k1, (B, feats_hidden, K), jnp.float32)
    history_enc = jax.random.normal(k2, (B, feats_hidden, K), jnp.float32)

    raw_params = init_params(k3, feats_hidden, blocks, flows)
    prepared = prepare_params(raw_params, feats_hidden=feats_hidden,
                              blocks=blocks, flows=flows, K=K, K_div=K)

    fwd = jax.jit(functools.partial(flow_aff_conv_act_forward,
                                    feats_hidden=feats_hidden, blocks=blocks,
                                    flows=flows, K_div=K))
    Z, log_det = fwd(future_enc, history_enc, prepared)
    jax.block_until_ready((Z, log_det))

    assert Z.shape == (B, feats_hidden, K), Z.shape
    assert log_det.shape == (1,), log_det.shape
    assert bool(jnp.all(jnp.isfinite(Z))) and bool(jnp.all(jnp.isfinite(log_det)))
    print("KERNEL_OK")
</pallas_src>

<mosaic_0001>
module attributes {stable_mosaic.version = 11 : i64} {
  func.func @_flow_block_kernel(%arg0: i32, %arg1: i32, %arg2: memref<24x32xf32, #tpu.memory_space<vmem>>, %arg3: memref<32x32xbf16, #tpu.memory_space<vmem>>, %arg4: memref<1x24x24xbf16, #tpu.memory_space<vmem>>, %arg5: memref<1x24x1xf32, #tpu.memory_space<vmem>>, %arg6: memref<1x32x44xbf16, #tpu.memory_space<vmem>>, %arg7: memref<1x32x1xf32, #tpu.memory_space<vmem>>, %arg8: memref<1x24x32xbf16, #tpu.memory_space<vmem>>, %arg9: memref<1x24x1xf32, #tpu.memory_space<vmem>>, %arg10: memref<24x32xf32, #tpu.memory_space<vmem>>, %arg11: memref<1x32xf32, #tpu.memory_space<vmem>>, %arg12: memref<44x32xbf16, #tpu.memory_space<vmem>>) attributes {dimension_semantics = [#tpu.dimension_semantics<parallel>, #tpu.dimension_semantics<arbitrary>], iteration_bounds = array<i64: 1, 2>, scalar_prefetch = 0 : i64, scratch_operands = 1 : i64, tpu.core_type = #tpu.core_type<tc>, window_params = [{transform_indices = @transform_0, window_bounds = array<i64: 24, 32>}, {transform_indices = @transform_1, window_bounds = array<i64: 32, 32>}, {transform_indices = @transform_2, window_bounds = array<i64: 1, 24, 24>}, {transform_indices = @transform_3, window_bounds = array<i64: 1, 24, 1>}, {transform_indices = @transform_4, window_bounds = array<i64: 1, 32, 44>}, {transform_indices = @transform_5, window_bounds = array<i64: 1, 32, 1>}, {transform_indices = @transform_6, window_bounds = array<i64: 1, 24, 32>}, {transform_indices = @transform_7, window_bounds = array<i64: 1, 24, 1>}, {transform_indices = @transform_8, window_bounds = array<i64: 24, 32>}, {transform_indices = @transform_9, window_bounds = array<i64: 1, 32>}]} {
    %c0_i32 = arith.constant 0 : i32
    %0 = arith.cmpi eq, %arg1, %c0_i32 : i32
    %1 = arith.extui %0 : i1 to i32
    %c0_i32_0 = arith.constant 0 : i32
    %2 = arith.cmpi ne, %1, %c0_i32_0 : i32
    scf.if %2 {
      %c0_34 = arith.constant 0 : index
      %c0_35 = arith.constant 0 : index
      %45 = vector.load %arg2[%c0_34, %c0_35] : memref<24x32xf32, #tpu.memory_space<vmem>>, vector<24x32xf32>
      %c0_36 = arith.constant 0 : index
      %c0_37 = arith.constant 0 : index
      %46 = vector.load %arg10[%c0_36, %c0_37] : memref<24x32xf32, #tpu.memory_space<vmem>>, vector<24x32xf32>
      tpu.vector_store %arg10[%c0_36, %c0_37], %45 {strides = array<i32>} : memref<24x32xf32, #tpu.memory_space<vmem>>, vector<24x32xf32>,
      %cst_38 = arith.constant 0.000000e+00 : f32
      %47 = vector.broadcast %cst_38 : f32 to vector<1x32xf32>
      %c0_39 = arith.constant 0 : index
      %c0_40 = arith.constant 0 : index
      %48 = vector.load %arg11[%c0_39, %c0_40] : memref<1x32xf32, #tpu.memory_space<vmem>>, vector<1x32xf32>
      tpu.vector_store %arg11[%c0_39, %c0_40], %47 {strides = array<i32>} : memref<1x32xf32, #tpu.memory_space<vmem>>, vector<1x32xf32>,
      %c0_41 = arith.constant 0 : index
      %c0_42 = arith.constant 0 : index
      %49 = vector.load %arg3[%c0_41, %c0_42] : memref<32x32xbf16, #tpu.memory_space<vmem>>, vector<32x32xbf16>
      %c12_43 = arith.constant 12 : index
      %c0_44 = arith.constant 0 : index
      %50 = vector.load %arg12[%c12_43, %c0_44] : memref<44x32xbf16, #tpu.memory_space<vmem>>, vector<32x32xbf16>
      tpu.vector_store %arg12[%c12_43, %c0_44], %49 {strides = array<i32>} : memref<44x32xbf16, #tpu.memory_space<vmem>>, vector<32x32xbf16>,
    } else {
    }
    %c0 = arith.constant 0 : index
    %c0_1 = arith.constant 0 : index
    %c0_2 = arith.constant 0 : index
    %3 = vector.load %arg4[%c0, %c0_1, %c0_2] : memref<1x24x24xbf16, #tpu.memory_space<vmem>>, vector<1x24x24xbf16>
    %4 = vector.shape_cast %3 : vector<1x24x24xbf16> to vector<24x24xbf16>
    %c0_3 = arith.constant 0 : index
    %c0_4 = arith.constant 0 : index
    %5 = vector.load %arg10[%c0_3, %c0_4] : memref<24x32xf32, #tpu.memory_space<vmem>>, vector<24x32xf32>
    %6 = arith.truncf %5 : vector<24x32xf32> to vector<24x32xbf16>
    %cst = arith.constant dense<0.000000e+00> : vector<24x32xf32>
    %7 = tpu.matmul %4, %6, %cst {dimension_numbers = #tpu.dot_dimension_numbers<[1], [0], [0], [1], [0, 0, 1, 1], [], []>} : vector<24x24xbf16>, vector<24x32xbf16>, vector<24x32xf32> -> vector<24x32xf32>
    %c0_5 = arith.constant 0 : index
    %c0_6 = arith.constant 0 : index
    %c0_7 = arith.constant 0 : index
    %8 = vector.load %arg5[%c0_5, %c0_6, %c0_7] : memref<1x24x1xf32, #tpu.memory_space<vmem>>, vector<1x24x1xf32>
    %9 = vector.shape_cast %8 : vector<1x24x1xf32> to vector<24x1xf32>
    %10 = vector.broadcast %9 : vector<24x1xf32> to vector<24x32xf32>
    %11 = arith.addf %7, %10 : vector<24x32xf32>
    %12 = vector.extract_strided_slice %11 {offsets = [0, 0], sizes = [12, 32], strides = [1, 1]} : vector<24x32xf32> to vector<12x32xf32>
    %13 = vector.extract_strided_slice %11 {offsets = [12, 0], sizes = [12, 32], strides = [1, 1]} : vector<24x32xf32> to vector<12x32xf32>
    %14 = arith.truncf %12 : vector<12x32xf32> to vector<12x32xbf16>
    %c0_8 = arith.constant 0 : index
    %c0_9 = arith.constant 0 : index
    %15 = vector.load %arg12[%c0_8, %c0_9] : memref<44x32xbf16, #tpu.memory_space<vmem>>, vector<12x32xbf16>
    tpu.vector_store %arg12[%c0_8, %c0_9], %14 {strides = array<i32>} : memref<44x32xbf16, #tpu.memory_space<vmem>>, vector<12x32xbf16>,
    %c0_10 = arith.constant 0 : index
    %c0_11 = arith.constant 0 : index
    %c0_12 = arith.constant 0 : index
    %16 = vector.load %arg6[%c0_10, %c0_11, %c0_12] : memref<1x32x44xbf16, #tpu.memory_space<vmem>>, vector<1x32x44xbf16>
    %17 = vector.shape_cast %16 : vector<1x32x44xbf16> to vector<32x44xbf16>
    %c0_13 = arith.constant 0 : index
    %c0_14 = arith.constant 0 : index
    %18 = vector.load %arg12[%c0_13, %c0_14] : memref<44x32xbf16, #tpu.memory_space<vmem>>, vector<44x32xbf16>
    %cst_15 = arith.constant dense<0.000000e+00> : vector<32x32xf32>
    %19 = tpu.matmul %17, %18, %cst_15 {dimension_numbers = #tpu.dot_dimension_numbers<[1], [0], [0], [1], [0, 0, 1, 1], [], []>} : vector<32x44xbf16>, vector<44x32xbf16>, vector<32x32xf32> -> vector<32x32xf32>
    %c0_16 = arith.constant 0 : index
    %c0_17 = arith.constant 0 : index
    %c0_18 = arith.constant 0 : index
    %20 = vector.load %arg7[%c0_16, %c0_17, %c0_18] : memref<1x32x1xf32, #tpu.memory_space<vmem>>, vector<1x32x1xf32>
    %21 = vector.shape_cast %20 : vector<1x32x1xf32> to vector<32x1xf32>
    %22 = vector.broadcast %21 : vector<32x1xf32> to vector<32x32xf32>
    %23 = arith.addf %19, %22 : vector<32x32xf32>
    %24 = math.tanh %23 : vector<32x32xf32>
    %c0_19 = arith.constant 0 : index
    %c0_20 = arith.constant 0 : index
    %c0_21 = arith.constant 0 : index
    %25 = vector.load %arg8[%c0_19, %c0_20, %c0_21] : memref<1x24x32xbf16, #tpu.memory_space<vmem>>, vector<1x24x32xbf16>
    %26 = vector.shape_cast %25 : vector<1x24x32xbf16> to vector<24x32xbf16>
    %27 = arith.truncf %24 : vector<32x32xf32> to vector<32x32xbf16>
    %cst_22 = arith.constant dense<0.000000e+00> : vector<24x32xf32>
    %28 = tpu.matmul %26, %27, %cst_22 {dimension_numbers = #tpu.dot_dimension_numbers<[1], [0], [0], [1], [0, 0, 1, 1], [], []>} : vector<24x32xbf16>, vector<32x32xbf16>, vector<24x32xf32> -> vector<24x32xf32>
    %c0_23 = arith.constant 0 : index
    %c0_24 = arith.constant 0 : index
    %c0_25 = arith.constant 0 : index
    %29 = vector.load %arg9[%c0_23, %c0_24, %c0_25] : memref<1x24x1xf32, #tpu.memory_space<vmem>>, vector<1x24x1xf32>
    %30 = vector.shape_cast %29 : vector<1x24x1xf32> to vector<24x1xf32>
    %31 = vector.broadcast %30 : vector<24x1xf32> to vector<24x32xf32>
    %32 = arith.addf %28, %31 : vector<24x32xf32>
    %33 = vector.extract_strided_slice %32 {offsets = [0, 0], sizes = [12, 32], strides = [1, 1]} : vector<24x32xf32> to vector<12x32xf32>
    %34 = vector.extract_strided_slice %32 {offsets = [12, 0], sizes = [12, 32], strides = [1, 1]} : vector<24x32xf32> to vector<12x32xf32>
    %c0_26 = arith.constant 0 : index
    %c0_27 = arith.constant 0 : index
    %35 = vector.load %arg10[%c0_26, %c0_27] : memref<24x32xf32, #tpu.memory_space<vmem>>, vector<12x32xf32>
    tpu.vector_store %arg10[%c0_26, %c0_27], %12 {strides = array<i32>} : memref<24x32xf32, #tpu.memory_space<vmem>>, vector<12x32xf32>,
    %36 = math.exp %33 : vector<12x32xf32>
    %37 = arith.mulf %13, %36 : vector<12x32xf32>
    %38 = arith.addf %37, %34 : vector<12x32xf32>
    %c12 = arith.constant 12 : index
    %c0_28 = arith.constant 0 : index
    %39 = vector.load %arg10[%c12, %c0_28] : memref<24x32xf32, #tpu.memory_space<vmem>>, vector<12x32xf32>
    tpu.vector_store %arg10[%c12, %c0_28], %38 {strides = array<i32>} : memref<24x32xf32, #tpu.memory_space<vmem>>, vector<12x32xf32>,
    %c0_29 = arith.constant 0 : index
    %c0_30 = arith.constant 0 : index
    %40 = vector.load %arg11[%c0_29, %c0_30] : memref<1x32xf32, #tpu.memory_space<vmem>>, vector<1x32xf32>
    %cst_31 = arith.constant dense<0.000000e+00> : vector<32xf32>
    %41 = vector.multi_reduction <add>, %33, %cst_31 [0] : vector<12x32xf32> to vector<32xf32>
    %42 = vector.shape_cast %41 : vector<32xf32> to vector<1x32xf32>
    %43 = arith.addf %40, %42 : vector<1x32xf32>
    %c0_32 = arith.constant 0 : index
    %c0_33 = arith.constant 0 : index
    %44 = vector.load %arg11[%c0_32, %c0_33] : memref<1x32xf32, #tpu.memory_space<vmem>>, vector<1x32xf32>
    tpu.vector_store %arg11[%c0_32, %c0_33], %43 {strides = array<i32>} : memref<1x32xf32, #tpu.memory_space<vmem>>, vector<1x32xf32>,
    return
  }
  func.func @transform_0(%arg0: i32, %arg1: i32) -> (i32, i32) {
    %c0_i32 = arith.constant 0 : i32
    %c0_i32_0 = arith.constant 0 : i32
    return %c0_i32, %arg0 : i32, i32
  }
  func.func @transform_1(%arg0: i32, %arg1: i32) -> (i32, i32) {
    %c0_i32 = arith.constant 0 : i32
    %c0_i32_0 = arith.constant 0 : i32
    return %c0_i32, %arg0 : i32, i32
  }
  func.func @transform_2(%arg0: i32, %arg1: i32) -> (i32, i32, i32) {
    %c0_i32 = arith.constant 0 : i32
    %c0_i32_0 = arith.constant 0 : i32
    %c0_i32_1 = arith.constant 0 : i32
    return %arg1, %c0_i32, %c0_i32_0 : i32, i32, i32
  }
  func.func @transform_3(%arg0: i32, %arg1: i32) -> (i32, i32, i32) {
    %c0_i32 = arith.constant 0 : i32
    %c0_i32_0 = arith.constant 0 : i32
    %c0_i32_1 = arith.constant 0 : i32
    return %arg1, %c0_i32, %c0_i32_0 : i32, i32, i32
  }
  func.func @transform_4(%arg0: i32, %arg1: i32) -> (i32, i32, i32) {
    %c0_i32 = arith.constant 0 : i32
    %c0_i32_0 = arith.constant 0 : i32
    %c0_i32_1 = arith.constant 0 : i32
    return %arg1, %c0_i32, %c0_i32_0 : i32, i32, i32
  }
  func.func @transform_5(%arg0: i32, %arg1: i32) -> (i32, i32, i32) {
    %c0_i32 = arith.constant 0 : i32
    %c0_i32_0 = arith.constant 0 : i32
    %c0_i32_1 = arith.constant 0 : i32
    return %arg1, %c0_i32, %c0_i32_0 : i32, i32, i32
  }
  func.func @transform_6(%arg0: i32, %arg1: i32) -> (i32, i32, i32) {
    %c0_i32 = arith.constant 0 : i32
    %c0_i32_0 = arith.constant 0 : i32
    %c0_i32_1 = arith.constant 0 : i32
    return %arg1, %c0_i32, %c0_i32_0 : i32, i32, i32
  }
  func.func @transform_7(%arg0: i32, %arg1: i32) -> (i32, i32, i32) {
    %c0_i32 = arith.constant 0 : i32
    %c0_i32_0 = arith.constant 0 : i32
    %c0_i32_1 = arith.constant 0 : i32
    return %arg1, %c0_i32, %c0_i32_0 : i32, i32, i32
  }
  func.func @transform_8(%arg0: i32, %arg1: i32) -> (i32, i32) {
    %c0_i32 = arith.constant 0 : i32
    %c0_i32_0 = arith.constant 0 : i32
    return %c0_i32, %arg0 : i32, i32
  }
  func.func @transform_9(%arg0: i32, %arg1: i32) -> (i32, i32) {
    %c0_i32 = arith.constant 0 : i32
    %c0_i32_0 = arith.constant 0 : i32
    return %c0_i32, %arg0 : i32, i32
  }
}

module attributes {stable_mosaic.version = 11 : i64} {
  func.func @_flow_block_kernel(%arg0: i32, %arg1: i32, %arg2: memref<16x32xf32, #tpu.memory_space<vmem>>, %arg3: memref<32x32xbf16, #tpu.memory_space<vmem>>, %arg4: memref<1x16x16xbf16, #tpu.memory_space<vmem>>, %arg5: memref<1x16x1xf32, #tpu.memory_space<vmem>>, %arg6: memref<1x32x40xbf16, #tpu.memory_space<vmem>>, %arg7: memref<1x32x1xf32, #tpu.memory_space<vmem>>, %arg8: memref<1x16x32xbf16, #tpu.memory_space<vmem>>, %arg9: memref<1x16x1xf32, #tpu.memory_space<vmem>>, %arg10: memref<16x32xf32, #tpu.memory_space<vmem>>, %arg11: memref<1x32xf32, #tpu.memory_space<vmem>>, %arg12: memref<40x32xbf16, #tpu.memory_space<vmem>>) attributes {dimension_semantics = [#tpu.dimension_semantics<parallel>, #tpu.dimension_semantics<arbitrary>], iteration_bounds = array<i64: 1, 2>, scalar_prefetch = 0 : i64, scratch_operands = 1 : i64, tpu.core_type = #tpu.core_type<tc>, window_params = [{transform_indices = @transform_0, window_bounds = array<i64: 16, 32>}, {transform_indices = @transform_1, window_bounds = array<i64: 32, 32>}, {transform_indices = @transform_2, window_bounds = array<i64: 1, 16, 16>}, {transform_indices = @transform_3, window_bounds = array<i64: 1, 16, 1>}, {transform_indices = @transform_4, window_bounds = array<i64: 1, 32, 40>}, {transform_indices = @transform_5, window_bounds = array<i64: 1, 32, 1>}, {transform_indices = @transform_6, window_bounds = array<i64: 1, 16, 32>}, {transform_indices = @transform_7, window_bounds = array<i64: 1, 16, 1>}, {transform_indices = @transform_8, window_bounds = array<i64: 16, 32>}, {transform_indices = @transform_9, window_bounds = array<i64: 1, 32>}]} {
    %c0_i32 = arith.constant 0 : i32
    %0 = arith.cmpi eq, %arg1, %c0_i32 : i32
    %1 = arith.extui %0 : i1 to i32
    %c0_i32_0 = arith.constant 0 : i32
    %2 = arith.cmpi ne, %1, %c0_i32_0 : i32
    scf.if %2 {
      %c0_34 = arith.constant 0 : index
      %c0_35 = arith.constant 0 : index
      %45 = vector.load %arg2[%c0_34, %c0_35] : memref<16x32xf32, #tpu.memory_space<vmem>>, vector<16x32xf32>
      %c0_36 = arith.constant 0 : index
      %c0_37 = arith.constant 0 : index
      %46 = vector.load %arg10[%c0_36, %c0_37] : memref<16x32xf32, #tpu.memory_space<vmem>>, vector<16x32xf32>
      tpu.vector_store %arg10[%c0_36, %c0_37], %45 {strides = array<i32>} : memref<16x32xf32, #tpu.memory_space<vmem>>, vector<16x32xf32>,
      %cst_38 = arith.constant 0.000000e+00 : f32
      %47 = vector.broadcast %cst_38 : f32 to vector<1x32xf32>
      %c0_39 = arith.constant 0 : index
      %c0_40 = arith.constant 0 : index
      %48 = vector.load %arg11[%c0_39, %c0_40] : memref<1x32xf32, #tpu.memory_space<vmem>>, vector<1x32xf32>
      tpu.vector_store %arg11[%c0_39, %c0_40], %47 {strides = array<i32>} : memref<1x32xf32, #tpu.memory_space<vmem>>, vector<1x32xf32>,
      %c0_41 = arith.constant 0 : index
      %c0_42 = arith.constant 0 : index
      %49 = vector.load %arg3[%c0_41, %c0_42] : memref<32x32xbf16, #tpu.memory_space<vmem>>, vector<32x32xbf16>
      %c8_43 = arith.constant 8 : index
      %c0_44 = arith.constant 0 : index
      %50 = vector.load %arg12[%c8_43, %c0_44] : memref<40x32xbf16, #tpu.memory_space<vmem>>, vector<32x32xbf16>
      tpu.vector_store %arg12[%c8_43, %c0_44], %49 {strides = array<i32>} : memref<40x32xbf16, #tpu.memory_space<vmem>>, vector<32x32xbf16>,
    } else {
    }
    %c0 = arith.constant 0 : index
    %c0_1 = arith.constant 0 : index
    %c0_2 = arith.constant 0 : index
    %3 = vector.load %arg4[%c0, %c0_1, %c0_2] : memref<1x16x16xbf16, #tpu.memory_space<vmem>>, vector<1x16x16xbf16>
    %4 = vector.shape_cast %3 : vector<1x16x16xbf16> to vector<16x16xbf16>
    %c0_3 = arith.constant 0 : index
    %c0_4 = arith.constant 0 : index
    %5 = vector.load %arg10[%c0_3, %c0_4] : memref<16x32xf32, #tpu.memory_space<vmem>>, vector<16x32xf32>
    %6 = arith.truncf %5 : vector<16x32xf32> to vector<16x32xbf16>
    %cst = arith.constant dense<0.000000e+00> : vector<16x32xf32>
    %7 = tpu.matmul %4, %6, %cst {dimension_numbers = #tpu.dot_dimension_numbers<[1], [0], [0], [1], [0, 0, 1, 1], [], []>} : vector<16x16xbf16>, vector<16x32xbf16>, vector<16x32xf32> -> vector<16x32xf32>
    %c0_5 = arith.constant 0 : index
    %c0_6 = arith.constant 0 : index
    %c0_7 = arith.constant 0 : index
    %8 = vector.load %arg5[%c0_5, %c0_6, %c0_7] : memref<1x16x1xf32, #tpu.memory_space<vmem>>, vector<1x16x1xf32>
    %9 = vector.shape_cast %8 : vector<1x16x1xf32> to vector<16x1xf32>
    %10 = vector.broadcast %9 : vector<16x1xf32> to vector<16x32xf32>
    %11 = arith.addf %7, %10 : vector<16x32xf32>
    %12 = vector.extract_strided_slice %11 {offsets = [0, 0], sizes = [8, 32], strides = [1, 1]} : vector<16x32xf32> to vector<8x32xf32>
    %13 = vector.extract_strided_slice %11 {offsets = [8, 0], sizes = [8, 32], strides = [1, 1]} : vector<16x32xf32> to vector<8x32xf32>
    %14 = arith.truncf %12 : vector<8x32xf32> to vector<8x32xbf16>
    %c0_8 = arith.constant 0 : index
    %c0_9 = arith.constant 0 : index
    %15 = vector.load %arg12[%c0_8, %c0_9] : memref<40x32xbf16, #tpu.memory_space<vmem>>, vector<8x32xbf16>
    tpu.vector_store %arg12[%c0_8, %c0_9], %14 {strides = array<i32>} : memref<40x32xbf16, #tpu.memory_space<vmem>>, vector<8x32xbf16>,
    %c0_10 = arith.constant 0 : index
    %c0_11 = arith.constant 0 : index
    %c0_12 = arith.constant 0 : index
    %16 = vector.load %arg6[%c0_10, %c0_11, %c0_12] : memref<1x32x40xbf16, #tpu.memory_space<vmem>>, vector<1x32x40xbf16>
    %17 = vector.shape_cast %16 : vector<1x32x40xbf16> to vector<32x40xbf16>
    %c0_13 = arith.constant 0 : index
    %c0_14 = arith.constant 0 : index
    %18 = vector.load %arg12[%c0_13, %c0_14] : memref<40x32xbf16, #tpu.memory_space<vmem>>, vector<40x32xbf16>
    %cst_15 = arith.constant dense<0.000000e+00> : vector<32x32xf32>
    %19 = tpu.matmul %17, %18, %cst_15 {dimension_numbers = #tpu.dot_dimension_numbers<[1], [0], [0], [1], [0, 0, 1, 1], [], []>} : vector<32x40xbf16>, vector<40x32xbf16>, vector<32x32xf32> -> vector<32x32xf32>
    %c0_16 = arith.constant 0 : index
    %c0_17 = arith.constant 0 : index
    %c0_18 = arith.constant 0 : index
    %20 = vector.load %arg7[%c0_16, %c0_17, %c0_18] : memref<1x32x1xf32, #tpu.memory_space<vmem>>, vector<1x32x1xf32>
    %21 = vector.shape_cast %20 : vector<1x32x1xf32> to vector<32x1xf32>
    %22 = vector.broadcast %21 : vector<32x1xf32> to vector<32x32xf32>
    %23 = arith.addf %19, %22 : vector<32x32xf32>
    %24 = math.tanh %23 : vector<32x32xf32>
    %c0_19 = arith.constant 0 : index
    %c0_20 = arith.constant 0 : index
    %c0_21 = arith.constant 0 : index
    %25 = vector.load %arg8[%c0_19, %c0_20, %c0_21] : memref<1x16x32xbf16, #tpu.memory_space<vmem>>, vector<1x16x32xbf16>
    %26 = vector.shape_cast %25 : vector<1x16x32xbf16> to vector<16x32xbf16>
    %27 = arith.truncf %24 : vector<32x32xf32> to vector<32x32xbf16>
    %cst_22 = arith.constant dense<0.000000e+00> : vector<16x32xf32>
    %28 = tpu.matmul %26, %27, %cst_22 {dimension_numbers = #tpu.dot_dimension_numbers<[1], [0], [0], [1], [0, 0, 1, 1], [], []>} : vector<16x32xbf16>, vector<32x32xbf16>, vector<16x32xf32> -> vector<16x32xf32>
    %c0_23 = arith.constant 0 : index
    %c0_24 = arith.constant 0 : index
    %c0_25 = arith.constant 0 : index
    %29 = vector.load %arg9[%c0_23, %c0_24, %c0_25] : memref<1x16x1xf32, #tpu.memory_space<vmem>>, vector<1x16x1xf32>
    %30 = vector.shape_cast %29 : vector<1x16x1xf32> to vector<16x1xf32>
    %31 = vector.broadcast %30 : vector<16x1xf32> to vector<16x32xf32>
    %32 = arith.addf %28, %31 : vector<16x32xf32>
    %33 = vector.extract_strided_slice %32 {offsets = [0, 0], sizes = [8, 32], strides = [1, 1]} : vector<16x32xf32> to vector<8x32xf32>
    %34 = vector.extract_strided_slice %32 {offsets = [8, 0], sizes = [8, 32], strides = [1, 1]} : vector<16x32xf32> to vector<8x32xf32>
    %c0_26 = arith.constant 0 : index
    %c0_27 = arith.constant 0 : index
    %35 = vector.load %arg10[%c0_26, %c0_27] : memref<16x32xf32, #tpu.memory_space<vmem>>, vector<8x32xf32>
    tpu.vector_store %arg10[%c0_26, %c0_27], %12 {strides = array<i32>} : memref<16x32xf32, #tpu.memory_space<vmem>>, vector<8x32xf32>,
    %36 = math.exp %33 : vector<8x32xf32>
    %37 = arith.mulf %13, %36 : vector<8x32xf32>
    %38 = arith.addf %37, %34 : vector<8x32xf32>
    %c8 = arith.constant 8 : index
    %c0_28 = arith.constant 0 : index
    %39 = vector.load %arg10[%c8, %c0_28] : memref<16x32xf32, #tpu.memory_space<vmem>>, vector<8x32xf32>
    tpu.vector_store %arg10[%c8, %c0_28], %38 {strides = array<i32>} : memref<16x32xf32, #tpu.memory_space<vmem>>, vector<8x32xf32>,
    %c0_29 = arith.constant 0 : index
    %c0_30 = arith.constant 0 : index
    %40 = vector.load %arg11[%c0_29, %c0_30] : memref<1x32xf32, #tpu.memory_space<vmem>>, vector<1x32xf32>
    %cst_31 = arith.constant dense<0.000000e+00> : vector<32xf32>
    %41 = vector.multi_reduction <add>, %33, %cst_31 [0] : vector<8x32xf32> to vector<32xf32>
    %42 = vector.shape_cast %41 : vector<32xf32> to vector<1x32xf32>
    %43 = arith.addf %40, %42 : vector<1x32xf32>
    %c0_32 = arith.constant 0 : index
    %c0_33 = arith.constant 0 : index
    %44 = vector.load %arg11[%c0_32, %c0_33] : memref<1x32xf32, #tpu.memory_space<vmem>>, vector<1x32xf32>
    tpu.vector_store %arg11[%c0_32, %c0_33], %43 {strides = array<i32>} : memref<1x32xf32, #tpu.memory_space<vmem>>, vector<1x32xf32>,
    return
  }
  func.func @transform_0(%arg0: i32, %arg1: i32) -> (i32, i32) {
    %c0_i32 = arith.constant 0 : i32
    %c0_i32_0 = arith.constant 0 : i32
    return %c0_i32, %arg0 : i32, i32
  }
  func.func @transform_1(%arg0: i32, %arg1: i32) -> (i32, i32) {
    %c0_i32 = arith.constant 0 : i32
    %c0_i32_0 = arith.constant 0 : i32
    return %c0_i32, %arg0 : i32, i32
  }
  func.func @transform_2(%arg0: i32, %arg1: i32) -> (i32, i32, i32) {
    %c0_i32 = arith.constant 0 : i32
    %c0_i32_0 = arith.constant 0 : i32
    %c0_i32_1 = arith.constant 0 : i32
    return %arg1, %c0_i32, %c0_i32_0 : i32, i32, i32
  }
  func.func @transform_3(%arg0: i32, %arg1: i32) -> (i32, i32, i32) {
    %c0_i32 = arith.constant 0 : i32
    %c0_i32_0 = arith.constant 0 : i32
    %c0_i32_1 = arith.constant 0 : i32
    return %arg1, %c0_i32, %c0_i32_0 : i32, i32, i32
  }
  func.func @transform_4(%arg0: i32, %arg1: i32) -> (i32, i32, i32) {
    %c0_i32 = arith.constant 0 : i32
    %c0_i32_0 = arith.constant 0 : i32
    %c0_i32_1 = arith.constant 0 : i32
    return %arg1, %c0_i32, %c0_i32_0 : i32, i32, i32
  }
  func.func @transform_5(%arg0: i32, %arg1: i32) -> (i32, i32, i32) {
    %c0_i32 = arith.constant 0 : i32
    %c0_i32_0 = arith.constant 0 : i32
    %c0_i32_1 = arith.constant 0 : i32
    return %arg1, %c0_i32, %c0_i32_0 : i32, i32, i32
  }
  func.func @transform_6(%arg0: i32, %arg1: i32) -> (i32, i32, i32) {
    %c0_i32 = arith.constant 0 : i32
    %c0_i32_0 = arith.constant 0 : i32
    %c0_i32_1 = arith.constant 0 : i32
    return %arg1, %c0_i32, %c0_i32_0 : i32, i32, i32
  }
  func.func @transform_7(%arg0: i32, %arg1: i32) -> (i32, i32, i32) {
    %c0_i32 = arith.constant 0 : i32
    %c0_i32_0 = arith.constant 0 : i32
    %c0_i32_1 = arith.constant 0 : i32
    return %arg1, %c0_i32, %c0_i32_0 : i32, i32, i32
  }
  func.func @transform_8(%arg0: i32, %arg1: i32) -> (i32, i32) {
    %c0_i32 = arith.constant 0 : i32
    %c0_i32_0 = arith.constant 0 : i32
    return %c0_i32, %arg0 : i32, i32
  }
  func.func @transform_9(%arg0: i32, %arg1: i32) -> (i32, i32) {
    %c0_i32 = arith.constant 0 : i32
    %c0_i32_0 = arith.constant 0 : i32
    return %c0_i32, %arg0 : i32, i32
  }
}

module attributes {stable_mosaic.version = 11 : i64} {
  func.func @_flow_block_kernel(%arg0: i32, %arg1: i32, %arg2: memref<8x32xf32, #tpu.memory_space<vmem>>, %arg3: memref<32x32xbf16, #tpu.memory_space<vmem>>, %arg4: memref<1x8x8xbf16, #tpu.memory_space<vmem>>, %arg5: memref<1x8x1xf32, #tpu.memory_space<vmem>>, %arg6: memref<1x32x36xbf16, #tpu.memory_space<vmem>>, %arg7: memref<1x32x1xf32, #tpu.memory_space<vmem>>, %arg8: memref<1x8x32xbf16, #tpu.memory_space<vmem>>, %arg9: memref<1x8x1xf32, #tpu.memory_space<vmem>>, %arg10: memref<8x32xf32, #tpu.memory_space<vmem>>, %arg11: memref<1x32xf32, #tpu.memory_space<vmem>>, %arg12: memref<36x32xbf16, #tpu.memory_space<vmem>>) attributes {dimension_semantics = [#tpu.dimension_semantics<parallel>, #tpu.dimension_semantics<arbitrary>], iteration_bounds = array<i64: 1, 2>, scalar_prefetch = 0 : i64, scratch_operands = 1 : i64, tpu.core_type = #tpu.core_type<tc>, window_params = [{transform_indices = @transform_0, window_bounds = array<i64: 8, 32>}, {transform_indices = @transform_1, window_bounds = array<i64: 32, 32>}, {transform_indices = @transform_2, window_bounds = array<i64: 1, 8, 8>}, {transform_indices = @transform_3, window_bounds = array<i64: 1, 8, 1>}, {transform_indices = @transform_4, window_bounds = array<i64: 1, 32, 36>}, {transform_indices = @transform_5, window_bounds = array<i64: 1, 32, 1>}, {transform_indices = @transform_6, window_bounds = array<i64: 1, 8, 32>}, {transform_indices = @transform_7, window_bounds = array<i64: 1, 8, 1>}, {transform_indices = @transform_8, window_bounds = array<i64: 8, 32>}, {transform_indices = @transform_9, window_bounds = array<i64: 1, 32>}]} {
    %c0_i32 = arith.constant 0 : i32
    %0 = arith.cmpi eq, %arg1, %c0_i32 : i32
    %1 = arith.extui %0 : i1 to i32
    %c0_i32_0 = arith.constant 0 : i32
    %2 = arith.cmpi ne, %1, %c0_i32_0 : i32
    scf.if %2 {
      %c0_34 = arith.constant 0 : index
      %c0_35 = arith.constant 0 : index
      %45 = vector.load %arg2[%c0_34, %c0_35] : memref<8x32xf32, #tpu.memory_space<vmem>>, vector<8x32xf32>
      %c0_36 = arith.constant 0 : index
      %c0_37 = arith.constant 0 : index
      %46 = vector.load %arg10[%c0_36, %c0_37] : memref<8x32xf32, #tpu.memory_space<vmem>>, vector<8x32xf32>
      tpu.vector_store %arg10[%c0_36, %c0_37], %45 {strides = array<i32>} : memref<8x32xf32, #tpu.memory_space<vmem>>, vector<8x32xf32>,
      %cst_38 = arith.constant 0.000000e+00 : f32
      %47 = vector.broadcast %cst_38 : f32 to vector<1x32xf32>
      %c0_39 = arith.constant 0 : index
      %c0_40 = arith.constant 0 : index
      %48 = vector.load %arg11[%c0_39, %c0_40] : memref<1x32xf32, #tpu.memory_space<vmem>>, vector<1x32xf32>
      tpu.vector_store %arg11[%c0_39, %c0_40], %47 {strides = array<i32>} : memref<1x32xf32, #tpu.memory_space<vmem>>, vector<1x32xf32>,
      %c0_41 = arith.constant 0 : index
      %c0_42 = arith.constant 0 : index
      %49 = vector.load %arg3[%c0_41, %c0_42] : memref<32x32xbf16, #tpu.memory_space<vmem>>, vector<32x32xbf16>
      %c4_43 = arith.constant 4 : index
      %c0_44 = arith.constant 0 : index
      %50 = vector.load %arg12[%c4_43, %c0_44] : memref<36x32xbf16, #tpu.memory_space<vmem>>, vector<32x32xbf16>
      tpu.vector_store %arg12[%c4_43, %c0_44], %49 {strides = array<i32>} : memref<36x32xbf16, #tpu.memory_space<vmem>>, vector<32x32xbf16>,
    } else {
    }
    %c0 = arith.constant 0 : index
    %c0_1 = arith.constant 0 : index
    %c0_2 = arith.constant 0 : index
    %3 = vector.load %arg4[%c0, %c0_1, %c0_2] : memref<1x8x8xbf16, #tpu.memory_space<vmem>>, vector<1x8x8xbf16>
    %4 = vector.shape_cast %3 : vector<1x8x8xbf16> to vector<8x8xbf16>
    %c0_3 = arith.constant 0 : index
    %c0_4 = arith.constant 0 : index
    %5 = vector.load %arg10[%c0_3, %c0_4] : memref<8x32xf32, #tpu.memory_space<vmem>>, vector<8x32xf32>
    %6 = arith.truncf %5 : vector<8x32xf32> to vector<8x32xbf16>
    %cst = arith.constant dense<0.000000e+00> : vector<8x32xf32>
    %7 = tpu.matmul %4, %6, %cst {dimension_numbers = #tpu.dot_dimension_numbers<[1], [0], [0], [1], [0, 0, 1, 1], [], []>} : vector<8x8xbf16>, vector<8x32xbf16>, vector<8x32xf32> -> vector<8x32xf32>
    %c0_5 = arith.constant 0 : index
    %c0_6 = arith.constant 0 : index
    %c0_7 = arith.constant 0 : index
    %8 = vector.load %arg5[%c0_5, %c0_6, %c0_7] : memref<1x8x1xf32, #tpu.memory_space<vmem>>, vector<1x8x1xf32>
    %9 = vector.shape_cast %8 : vector<1x8x1xf32> to vector<8x1xf32>
    %10 = vector.broadcast %9 : vector<8x1xf32> to vector<8x32xf32>
    %11 = arith.addf %7, %10 : vector<8x32xf32>
    %12 = vector.extract_strided_slice %11 {offsets = [0, 0], sizes = [4, 32], strides = [1, 1]} : vector<8x32xf32> to vector<4x32xf32>
    %13 = vector.extract_strided_slice %11 {offsets = [4, 0], sizes = [4, 32], strides = [1, 1]} : vector<8x32xf32> to vector<4x32xf32>
    %14 = arith.truncf %12 : vector<4x32xf32> to vector<4x32xbf16>
    %c0_8 = arith.constant 0 : index
    %c0_9 = arith.constant 0 : index
    %15 = vector.load %arg12[%c0_8, %c0_9] : memref<36x32xbf16, #tpu.memory_space<vmem>>, vector<4x32xbf16>
    tpu.vector_store %arg12[%c0_8, %c0_9], %14 {strides = array<i32>} : memref<36x32xbf16, #tpu.memory_space<vmem>>, vector<4x32xbf16>,
    %c0_10 = arith.constant 0 : index
    %c0_11 = arith.constant 0 : index
    %c0_12 = arith.constant 0 : index
    %16 = vector.load %arg6[%c0_10, %c0_11, %c0_12] : memref<1x32x36xbf16, #tpu.memory_space<vmem>>, vector<1x32x36xbf16>
    %17 = vector.shape_cast %16 : vector<1x32x36xbf16> to vector<32x36xbf16>
    %c0_13 = arith.constant 0 : index
    %c0_14 = arith.constant 0 : index
    %18 = vector.load %arg12[%c0_13, %c0_14] : memref<36x32xbf16, #tpu.memory_space<vmem>>, vector<36x32xbf16>
    %cst_15 = arith.constant dense<0.000000e+00> : vector<32x32xf32>
    %19 = tpu.matmul %17, %18, %cst_15 {dimension_numbers = #tpu.dot_dimension_numbers<[1], [0], [0], [1], [0, 0, 1, 1], [], []>} : vector<32x36xbf16>, vector<36x32xbf16>, vector<32x32xf32> -> vector<32x32xf32>
    %c0_16 = arith.constant 0 : index
    %c0_17 = arith.constant 0 : index
    %c0_18 = arith.constant 0 : index
    %20 = vector.load %arg7[%c0_16, %c0_17, %c0_18] : memref<1x32x1xf32, #tpu.memory_space<vmem>>, vector<1x32x1xf32>
    %21 = vector.shape_cast %20 : vector<1x32x1xf32> to vector<32x1xf32>
    %22 = vector.broadcast %21 : vector<32x1xf32> to vector<32x32xf32>
    %23 = arith.addf %19, %22 : vector<32x32xf32>
    %24 = math.tanh %23 : vector<32x32xf32>
    %c0_19 = arith.constant 0 : index
    %c0_20 = arith.constant 0 : index
    %c0_21 = arith.constant 0 : index
    %25 = vector.load %arg8[%c0_19, %c0_20, %c0_21] : memref<1x8x32xbf16, #tpu.memory_space<vmem>>, vector<1x8x32xbf16>
    %26 = vector.shape_cast %25 : vector<1x8x32xbf16> to vector<8x32xbf16>
    %27 = arith.truncf %24 : vector<32x32xf32> to vector<32x32xbf16>
    %cst_22 = arith.constant dense<0.000000e+00> : vector<8x32xf32>
    %28 = tpu.matmul %26, %27, %cst_22 {dimension_numbers = #tpu.dot_dimension_numbers<[1], [0], [0], [1], [0, 0, 1, 1], [], []>} : vector<8x32xbf16>, vector<32x32xbf16>, vector<8x32xf32> -> vector<8x32xf32>
    %c0_23 = arith.constant 0 : index
    %c0_24 = arith.constant 0 : index
    %c0_25 = arith.constant 0 : index
    %29 = vector.load %arg9[%c0_23, %c0_24, %c0_25] : memref<1x8x1xf32, #tpu.memory_space<vmem>>, vector<1x8x1xf32>
    %30 = vector.shape_cast %29 : vector<1x8x1xf32> to vector<8x1xf32>
    %31 = vector.broadcast %30 : vector<8x1xf32> to vector<8x32xf32>
    %32 = arith.addf %28, %31 : vector<8x32xf32>
    %33 = vector.extract_strided_slice %32 {offsets = [0, 0], sizes = [4, 32], strides = [1, 1]} : vector<8x32xf32> to vector<4x32xf32>
    %34 = vector.extract_strided_slice %32 {offsets = [4, 0], sizes = [4, 32], strides = [1, 1]} : vector<8x32xf32> to vector<4x32xf32>
    %c0_26 = arith.constant 0 : index
    %c0_27 = arith.constant 0 : index
    %35 = vector.load %arg10[%c0_26, %c0_27] : memref<8x32xf32, #tpu.memory_space<vmem>>, vector<4x32xf32>
    tpu.vector_store %arg10[%c0_26, %c0_27], %12 {strides = array<i32>} : memref<8x32xf32, #tpu.memory_space<vmem>>, vector<4x32xf32>,
    %36 = math.exp %33 : vector<4x32xf32>
    %37 = arith.mulf %13, %36 : vector<4x32xf32>
    %38 = arith.addf %37, %34 : vector<4x32xf32>
    %c4 = arith.constant 4 : index
    %c0_28 = arith.constant 0 : index
    %39 = vector.load %arg10[%c4, %c0_28] : memref<8x32xf32, #tpu.memory_space<vmem>>, vector<4x32xf32>
    tpu.vector_store %arg10[%c4, %c0_28], %38 {strides = array<i32>} : memref<8x32xf32, #tpu.memory_space<vmem>>, vector<4x32xf32>,
    %c0_29 = arith.constant 0 : index
    %c0_30 = arith.constant 0 : index
    %40 = vector.load %arg11[%c0_29, %c0_30] : memref<1x32xf32, #tpu.memory_space<vmem>>, vector<1x32xf32>
    %cst_31 = arith.constant dense<0.000000e+00> : vector<32xf32>
    %41 = vector.multi_reduction <add>, %33, %cst_31 [0] : vector<4x32xf32> to vector<32xf32>
    %42 = vector.shape_cast %41 : vector<32xf32> to vector<1x32xf32>
    %43 = arith.addf %40, %42 : vector<1x32xf32>
    %c0_32 = arith.constant 0 : index
    %c0_33 = arith.constant 0 : index
    %44 = vector.load %arg11[%c0_32, %c0_33] : memref<1x32xf32, #tpu.memory_space<vmem>>, vector<1x32xf32>
    tpu.vector_store %arg11[%c0_32, %c0_33], %43 {strides = array<i32>} : memref<1x32xf32, #tpu.memory_space<vmem>>, vector<1x32xf32>,
    return
  }
  func.func @transform_0(%arg0: i32, %arg1: i32) -> (i32, i32) {
    %c0_i32 = arith.constant 0 : i32
    %c0_i32_0 = arith.constant 0 : i32
    return %c0_i32, %arg0 : i32, i32
  }
  func.func @transform_1(%arg0: i32, %arg1: i32) -> (i32, i32) {
    %c0_i32 = arith.constant 0 : i32
    %c0_i32_0 = arith.constant 0 : i32
    return %c0_i32, %arg0 : i32, i32
  }
  func.func @transform_2(%arg0: i32, %arg1: i32) -> (i32, i32, i32) {
    %c0_i32 = arith.constant 0 : i32
    %c0_i32_0 = arith.constant 0 : i32
    %c0_i32_1 = arith.constant 0 : i32
    return %arg1, %c0_i32, %c0_i32_0 : i32, i32, i32
  }
  func.func @transform_3(%arg0: i32, %arg1: i32) -> (i32, i32, i32) {
    %c0_i32 = arith.constant 0 : i32
    %c0_i32_0 = arith.constant 0 : i32
    %c0_i32_1 = arith.constant 0 : i32
    return %arg1, %c0_i32, %c0_i32_0 : i32, i32, i32
  }
  func.func @transform_4(%arg0: i32, %arg1: i32) -> (i32, i32, i32) {
    %c0_i32 = arith.constant 0 : i32
    %c0_i32_0 = arith.constant 0 : i32
    %c0_i32_1 = arith.constant 0 : i32
    return %arg1, %c0_i32, %c0_i32_0 : i32, i32, i32
  }
  func.func @transform_5(%arg0: i32, %arg1: i32) -> (i32, i32, i32) {
    %c0_i32 = arith.constant 0 : i32
    %c0_i32_0 = arith.constant 0 : i32
    %c0_i32_1 = arith.constant 0 : i32
    return %arg1, %c0_i32, %c0_i32_0 : i32, i32, i32
  }
  func.func @transform_6(%arg0: i32, %arg1: i32) -> (i32, i32, i32) {
    %c0_i32 = arith.constant 0 : i32
    %c0_i32_0 = arith.constant 0 : i32
    %c0_i32_1 = arith.constant 0 : i32
    return %arg1, %c0_i32, %c0_i32_0 : i32, i32, i32
  }
  func.func @transform_7(%arg0: i32, %arg1: i32) -> (i32, i32, i32) {
    %c0_i32 = arith.constant 0 : i32
    %c0_i32_0 = arith.constant 0 : i32
    %c0_i32_1 = arith.constant 0 : i32
    return %arg1, %c0_i32, %c0_i32_0 : i32, i32, i32
  }
  func.func @transform_8(%arg0: i32, %arg1: i32) -> (i32, i32) {
    %c0_i32 = arith.constant 0 : i32
    %c0_i32_0 = arith.constant 0 : i32
    return %c0_i32, %arg0 : i32, i32
  }
  func.func @transform_9(%arg0: i32, %arg1: i32) -> (i32, i32) {
    %c0_i32 = arith.constant 0 : i32
    %c0_i32_0 = arith.constant 0 : i32
    return %c0_i32, %arg0 : i32, i32
  }
}

module attributes {stable_mosaic.version = 11 : i64} {
  func.func @_flow_block_kernel(%arg0: i32, %arg1: i32, %arg2: memref<32x32xf32, #tpu.memory_space<vmem>>, %arg3: memref<32x32xbf16, #tpu.memory_space<vmem>>, %arg4: memref<1x32x32xbf16, #tpu.memory_space<vmem>>, %arg5: memref<1x32x1xf32, #tpu.memory_space<vmem>>, %arg6: memref<1x32x48xbf16, #tpu.memory_space<vmem>>, %arg7: memref<1x32x1xf32, #tpu.memory_space<vmem>>, %arg8: memref<1x32x32xbf16, #tpu.memory_space<vmem>>, %arg9: memref<1x32x1xf32, #tpu.memory_space<vmem>>, %arg10: memref<32x32xf32, #tpu.memory_space<vmem>>, %arg11: memref<1x32xf32, #tpu.memory_space<vmem>>, %arg12: memref<48x32xbf16, #tpu.memory_space<vmem>>) attributes {dimension_semantics = [#tpu.dimension_semantics<parallel>, #tpu.dimension_semantics<arbitrary>], iteration_bounds = array<i64: 1, 2>, scalar_prefetch = 0 : i64, scratch_operands = 1 : i64, tpu.core_type = #tpu.core_type<tc>, window_params = [{transform_indices = @transform_0, window_bounds = array<i64: 32, 32>}, {transform_indices = @transform_1, window_bounds = array<i64: 32, 32>}, {transform_indices = @transform_2, window_bounds = array<i64: 1, 32, 32>}, {transform_indices = @transform_3, window_bounds = array<i64: 1, 32, 1>}, {transform_indices = @transform_4, window_bounds = array<i64: 1, 32, 48>}, {transform_indices = @transform_5, window_bounds = array<i64: 1, 32, 1>}, {transform_indices = @transform_6, window_bounds = array<i64: 1, 32, 32>}, {transform_indices = @transform_7, window_bounds = array<i64: 1, 32, 1>}, {transform_indices = @transform_8, window_bounds = array<i64: 32, 32>}, {transform_indices = @transform_9, window_bounds = array<i64: 1, 32>}]} {
    %c0_i32 = arith.constant 0 : i32
    %0 = arith.cmpi eq, %arg1, %c0_i32 : i32
    %1 = arith.extui %0 : i1 to i32
    %c0_i32_0 = arith.constant 0 : i32
    %2 = arith.cmpi ne, %1, %c0_i32_0 : i32
    scf.if %2 {
      %c0_34 = arith.constant 0 : index
      %c0_35 = arith.constant 0 : index
      %45 = vector.load %arg2[%c0_34, %c0_35] : memref<32x32xf32, #tpu.memory_space<vmem>>, vector<32x32xf32>
      %c0_36 = arith.constant 0 : index
      %c0_37 = arith.constant 0 : index
      %46 = vector.load %arg10[%c0_36, %c0_37] : memref<32x32xf32, #tpu.memory_space<vmem>>, vector<32x32xf32>
      tpu.vector_store %arg10[%c0_36, %c0_37], %45 {strides = array<i32>} : memref<32x32xf32, #tpu.memory_space<vmem>>, vector<32x32xf32>,
      %cst_38 = arith.constant 0.000000e+00 : f32
      %47 = vector.broadcast %cst_38 : f32 to vector<1x32xf32>
      %c0_39 = arith.constant 0 : index
      %c0_40 = arith.constant 0 : index
      %48 = vector.load %arg11[%c0_39, %c0_40] : memref<1x32xf32, #tpu.memory_space<vmem>>, vector<1x32xf32>
      tpu.vector_store %arg11[%c0_39, %c0_40], %47 {strides = array<i32>} : memref<1x32xf32, #tpu.memory_space<vmem>>, vector<1x32xf32>,
      %c0_41 = arith.constant 0 : index
      %c0_42 = arith.constant 0 : index
      %49 = vector.load %arg3[%c0_41, %c0_42] : memref<32x32xbf16, #tpu.memory_space<vmem>>, vector<32x32xbf16>
      %c16_43 = arith.constant 16 : index
      %c0_44 = arith.constant 0 : index
      %50 = vector.load %arg12[%c16_43, %c0_44] : memref<48x32xbf16, #tpu.memory_space<vmem>>, vector<32x32xbf16>
      tpu.vector_store %arg12[%c16_43, %c0_44], %49 {strides = array<i32>} : memref<48x32xbf16, #tpu.memory_space<vmem>>, vector<32x32xbf16>,
    } else {
    }
    %c0 = arith.constant 0 : index
    %c0_1 = arith.constant 0 : index
    %c0_2 = arith.constant 0 : index
    %3 = vector.load %arg4[%c0, %c0_1, %c0_2] : memref<1x32x32xbf16, #tpu.memory_space<vmem>>, vector<1x32x32xbf16>
    %4 = vector.shape_cast %3 : vector<1x32x32xbf16> to vector<32x32xbf16>
    %c0_3 = arith.constant 0 : index
    %c0_4 = arith.constant 0 : index
    %5 = vector.load %arg10[%c0_3, %c0_4] : memref<32x32xf32, #tpu.memory_space<vmem>>, vector<32x32xf32>
    %6 = arith.truncf %5 : vector<32x32xf32> to vector<32x32xbf16>
    %cst = arith.constant dense<0.000000e+00> : vector<32x32xf32>
    %7 = tpu.matmul %4, %6, %cst {dimension_numbers = #tpu.dot_dimension_numbers<[1], [0], [0], [1], [0, 0, 1, 1], [], []>} : vector<32x32xbf16>, vector<32x32xbf16>, vector<32x32xf32> -> vector<32x32xf32>
    %c0_5 = arith.constant 0 : index
    %c0_6 = arith.constant 0 : index
    %c0_7 = arith.constant 0 : index
    %8 = vector.load %arg5[%c0_5, %c0_6, %c0_7] : memref<1x32x1xf32, #tpu.memory_space<vmem>>, vector<1x32x1xf32>
    %9 = vector.shape_cast %8 : vector<1x32x1xf32> to vector<32x1xf32>
    %10 = vector.broadcast %9 : vector<32x1xf32> to vector<32x32xf32>
    %11 = arith.addf %7, %10 : vector<32x32xf32>
    %12 = vector.extract_strided_slice %11 {offsets = [0, 0], sizes = [16, 32], strides = [1, 1]} : vector<32x32xf32> to vector<16x32xf32>
    %13 = vector.extract_strided_slice %11 {offsets = [16, 0], sizes = [16, 32], strides = [1, 1]} : vector<32x32xf32> to vector<16x32xf32>
    %14 = arith.truncf %12 : vector<16x32xf32> to vector<16x32xbf16>
    %c0_8 = arith.constant 0 : index
    %c0_9 = arith.constant 0 : index
    %15 = vector.load %arg12[%c0_8, %c0_9] : memref<48x32xbf16, #tpu.memory_space<vmem>>, vector<16x32xbf16>
    tpu.vector_store %arg12[%c0_8, %c0_9], %14 {strides = array<i32>} : memref<48x32xbf16, #tpu.memory_space<vmem>>, vector<16x32xbf16>,
    %c0_10 = arith.constant 0 : index
    %c0_11 = arith.constant 0 : index
    %c0_12 = arith.constant 0 : index
    %16 = vector.load %arg6[%c0_10, %c0_11, %c0_12] : memref<1x32x48xbf16, #tpu.memory_space<vmem>>, vector<1x32x48xbf16>
    %17 = vector.shape_cast %16 : vector<1x32x48xbf16> to vector<32x48xbf16>
    %c0_13 = arith.constant 0 : index
    %c0_14 = arith.constant 0 : index
    %18 = vector.load %arg12[%c0_13, %c0_14] : memref<48x32xbf16, #tpu.memory_space<vmem>>, vector<48x32xbf16>
    %cst_15 = arith.constant dense<0.000000e+00> : vector<32x32xf32>
    %19 = tpu.matmul %17, %18, %cst_15 {dimension_numbers = #tpu.dot_dimension_numbers<[1], [0], [0], [1], [0, 0, 1, 1], [], []>} : vector<32x48xbf16>, vector<48x32xbf16>, vector<32x32xf32> -> vector<32x32xf32>
    %c0_16 = arith.constant 0 : index
    %c0_17 = arith.constant 0 : index
    %c0_18 = arith.constant 0 : index
    %20 = vector.load %arg7[%c0_16, %c0_17, %c0_18] : memref<1x32x1xf32, #tpu.memory_space<vmem>>, vector<1x32x1xf32>
    %21 = vector.shape_cast %20 : vector<1x32x1xf32> to vector<32x1xf32>
    %22 = vector.broadcast %21 : vector<32x1xf32> to vector<32x32xf32>
    %23 = arith.addf %19, %22 : vector<32x32xf32>
    %24 = math.tanh %23 : vector<32x32xf32>
    %c0_19 = arith.constant 0 : index
    %c0_20 = arith.constant 0 : index
    %c0_21 = arith.constant 0 : index
    %25 = vector.load %arg8[%c0_19, %c0_20, %c0_21] : memref<1x32x32xbf16, #tpu.memory_space<vmem>>, vector<1x32x32xbf16>
    %26 = vector.shape_cast %25 : vector<1x32x32xbf16> to vector<32x32xbf16>
    %27 = arith.truncf %24 : vector<32x32xf32> to vector<32x32xbf16>
    %cst_22 = arith.constant dense<0.000000e+00> : vector<32x32xf32>
    %28 = tpu.matmul %26, %27, %cst_22 {dimension_numbers = #tpu.dot_dimension_numbers<[1], [0], [0], [1], [0, 0, 1, 1], [], []>} : vector<32x32xbf16>, vector<32x32xbf16>, vector<32x32xf32> -> vector<32x32xf32>
    %c0_23 = arith.constant 0 : index
    %c0_24 = arith.constant 0 : index
    %c0_25 = arith.constant 0 : index
    %29 = vector.load %arg9[%c0_23, %c0_24, %c0_25] : memref<1x32x1xf32, #tpu.memory_space<vmem>>, vector<1x32x1xf32>
    %30 = vector.shape_cast %29 : vector<1x32x1xf32> to vector<32x1xf32>
    %31 = vector.broadcast %30 : vector<32x1xf32> to vector<32x32xf32>
    %32 = arith.addf %28, %31 : vector<32x32xf32>
    %33 = vector.extract_strided_slice %32 {offsets = [0, 0], sizes = [16, 32], strides = [1, 1]} : vector<32x32xf32> to vector<16x32xf32>
    %34 = vector.extract_strided_slice %32 {offsets = [16, 0], sizes = [16, 32], strides = [1, 1]} : vector<32x32xf32> to vector<16x32xf32>
    %c0_26 = arith.constant 0 : index
    %c0_27 = arith.constant 0 : index
    %35 = vector.load %arg10[%c0_26, %c0_27] : memref<32x32xf32, #tpu.memory_space<vmem>>, vector<16x32xf32>
    tpu.vector_store %arg10[%c0_26, %c0_27], %12 {strides = array<i32>} : memref<32x32xf32, #tpu.memory_space<vmem>>, vector<16x32xf32>,
    %36 = math.exp %33 : vector<16x32xf32>
    %37 = arith.mulf %13, %36 : vector<16x32xf32>
    %38 = arith.addf %37, %34 : vector<16x32xf32>
    %c16 = arith.constant 16 : index
    %c0_28 = arith.constant 0 : index
    %39 = vector.load %arg10[%c16, %c0_28] : memref<32x32xf32, #tpu.memory_space<vmem>>, vector<16x32xf32>
    tpu.vector_store %arg10[%c16, %c0_28], %38 {strides = array<i32>} : memref<32x32xf32, #tpu.memory_space<vmem>>, vector<16x32xf32>,
    %c0_29 = arith.constant 0 : index
    %c0_30 = arith.constant 0 : index
    %40 = vector.load %arg11[%c0_29, %c0_30] : memref<1x32xf32, #tpu.memory_space<vmem>>, vector<1x32xf32>
    %cst_31 = arith.constant dense<0.000000e+00> : vector<32xf32>
    %41 = vector.multi_reduction <add>, %33, %cst_31 [0] : vector<16x32xf32> to vector<32xf32>
    %42 = vector.shape_cast %41 : vector<32xf32> to vector<1x32xf32>
    %43 = arith.addf %40, %42 : vector<1x32xf32>
    %c0_32 = arith.constant 0 : index
    %c0_33 = arith.constant 0 : index
    %44 = vector.load %arg11[%c0_32, %c0_33] : memref<1x32xf32, #tpu.memory_space<vmem>>, vector<1x32xf32>
    tpu.vector_store %arg11[%c0_32, %c0_33], %43 {strides = array<i32>} : memref<1x32xf32, #tpu.memory_space<vmem>>, vector<1x32xf32>,
    return
  }
  func.func @transform_0(%arg0: i32, %arg1: i32) -> (i32, i32) {
    %c0_i32 = arith.constant 0 : i32
    %c0_i32_0 = arith.constant 0 : i32
    return %c0_i32, %arg0 : i32, i32
  }
  func.func @transform_1(%arg0: i32, %arg1: i32) -> (i32, i32) {
    %c0_i32 = arith.constant 0 : i32
    %c0_i32_0 = arith.constant 0 : i32
    return %c0_i32, %arg0 : i32, i32
  }
  func.func @transform_2(%arg0: i32, %arg1: i32) -> (i32, i32, i32) {
    %c0_i32 = arith.constant 0 : i32
    %c0_i32_0 = arith.constant 0 : i32
    %c0_i32_1 = arith.constant 0 : i32
    return %arg1, %c0_i32, %c0_i32_0 : i32, i32, i32
  }
  func.func @transform_3(%arg0: i32, %arg1: i32) -> (i32, i32, i32) {
    %c0_i32 = arith.constant 0 : i32
    %c0_i32_0 = arith.constant 0 : i32
    %c0_i32_1 = arith.constant 0 : i32
    return %arg1, %c0_i32, %c0_i32_0 : i32, i32, i32
  }
  func.func @transform_4(%arg0: i32, %arg1: i32) -> (i32, i32, i32) {
    %c0_i32 = arith.constant 0 : i32
    %c0_i32_0 = arith.constant 0 : i32
    %c0_i32_1 = arith.constant 0 : i32
    return %arg1, %c0_i32, %c0_i32_0 : i32, i32, i32
  }
  func.func @transform_5(%arg0: i32, %arg1: i32) -> (i32, i32, i32) {
    %c0_i32 = arith.constant 0 : i32
    %c0_i32_0 = arith.constant 0 : i32
    %c0_i32_1 = arith.constant 0 : i32
    return %arg1, %c0_i32, %c0_i32_0 : i32, i32, i32
  }
  func.func @transform_6(%arg0: i32, %arg1: i32) -> (i32, i32, i32) {
    %c0_i32 = arith.constant 0 : i32
    %c0_i32_0 = arith.constant 0 : i32
    %c0_i32_1 = arith.constant 0 : i32
    return %arg1, %c0_i32, %c0_i32_0 : i32, i32, i32
  }
  func.func @transform_7(%arg0: i32, %arg1: i32) -> (i32, i32, i32) {
    %c0_i32 = arith.constant 0 : i32
    %c0_i32_0 = arith.constant 0 : i32
    %c0_i32_1 = arith.constant 0 : i32
    return %arg1, %c0_i32, %c0_i32_0 : i32, i32, i32
  }
  func.func @transform_8(%arg0: i32, %arg1: i32) -> (i32, i32) {
    %c0_i32 = arith.constant 0 : i32
    %c0_i32_0 = arith.constant 0 : i32
    return %c0_i32, %arg0 : i32, i32
  }
  func.func @transform_9(%arg0: i32, %arg1: i32) -> (i32, i32) {
    %c0_i32 = arith.constant 0 : i32
    %c0_i32_0 = arith.constant 0 : i32
    return %c0_i32, %arg0 : i32, i32
  }
}

</mosaic_0001>

<bundles_post_ra>
// kernel: flow_aff_conv_act_forward.7
= control target key start
LH: loop header
LB: loop body
LE: loop exit
PB: predicated region body
PF: predicated region fallthrough
CT: control target
= control target key end

     0   :  { %s1135_s30 = smov 0   ;;  %s1137_s10 = smov 0   ;;  %s1259_s0 = inlined_call_operand.vmem [shape: f32[8,32], index: 0, kind: input, shape index: {}]   ;;  %s1260_s1 = inlined_call_operand.vmem [shape: bf16[32,32], index: 1, kind: input, shape index: {}]   ;;  %s1261_s2 = inlined_call_operand.vmem [shape: bf16[2,8,8], index: 2, kind: input, shape index: {}]   ;;  %s1262_s3 = inlined_call_operand.vmem [shape: f32[2,8,1], index: 3, kind: input, shape index: {}]   ;;  %s1263_s4 = inlined_call_operand.vmem [shape: bf16[2,32,36], index: 4, kind: input, shape index: {}]   ;;  %s1264_s5 = inlined_call_operand.vmem [shape: f32[2,32,1], index: 5, kind: input, shape index: {}]   ;;  %s1265_s6 = inlined_call_operand.vmem [shape: bf16[2,8,32], index: 6, kind: input, shape index: {}]   ;;  %s1266_s7 = inlined_call_operand.vmem [shape: f32[2,8,1], index: 7, kind: input, shape index: {}]   ;;  %s1267_s8 = inlined_call_operand.vmem [shape: f32[8,32], index: 8, kind: output, shape index: {0}]   ;;  %s1268_s9 = inlined_call_operand.vmem [shape: f32[1,32], index: 9, kind: output, shape index: {1}]  }
   0x1   :  { %1269 = sst [smem:[#allocation3_spill]] %s1261_s2  ;;  %s1139_s11 = smov 0  }
   0x2   :  { %1270 = sst [smem:[#allocation4_spill]] %s1262_s3 }
   0x3 LB: > { %s29_s12 = sadd.s32 1, %s1075_s10  ;;  %p952_p0 = scmp.ge.s32.totalorder %s1079_s11, 1  ;;  %s1079_s11 = sphi %s1139_s11, %s20_s11   ;;  %s1075_s10 = sphi %s1137_s10, %s1276_s10   ;;  %s1071_s30 = sphi %s1135_s30, %s1275_s30  }
   0x4   : > { %p30_p1 = scmp.ge.s32.totalorder %s29_s12, 2  ;;  %p366_p2 = scmp.lt.s32.totalorder %s1079_s11, 3 }
   0x6   : > { %s1278_s12 = smov (%p30_p1, %s29_s12), 0  ;;  %p367_p3 = pnand %p952_p0, %p366_p2 }
   0x7   : > { %p441_p4 = scmp.lt.s32.totalorder (!%p367_p3), %s1071_s30, 1  ;;  %s1271_s2 = sld [smem:[#allocation3_spill]] (!%p367_p3) }
   0x8   : > { %370 = sbr.rel (%p367_p3) target bundleno = 691 (0x2b3), region = 52  ;;  %s1272_s3 = sld [smem:[#allocation4_spill]] (!%p367_p3) }
   0x9   : > { %p961_p5 = scmp.ne.s32.totalorder (!%p367_p3), %s1071_s30, 0 }
   0xd   : > { %s442_s13 = scalar_select %p441_p4, %s1071_s30, 1 }
   0xf   : > { %s953_s14 = sshll.u32 %s442_s13, 2  ;;  %s954_s15 = sshll.u32 %s442_s13, 3 }
  0x10   : > { %s1156_s18 = scalar_lea.vmem %s1271_s2, %s953_s14  ;;  %s1161_s21 = scalar_lea.vmem %s1272_s3, %s954_s15 }
  0x11   : > { %s975_s22 = sshll.u32 %s442_s13, 4  ;;  %s976_s23 = sshll.u32 %s442_s13, 5 }
  0x12   : > { %s1166_s26 = scalar_lea.vmem %s1263_s4, %s975_s22  ;;  %s1171_s29 = scalar_lea.vmem %s1264_s5, %s976_s23 }
  0x13   : > { %s1176_s2 = scalar_lea.vmem %s1265_s6, %s953_s14  ;;  %s1181_s3 = scalar_lea.vmem %s1266_s7, %s954_s15 }
  0x14   : > { %478 = sbr.rel (%p961_p5) target bundleno = 35 (0x23), region = 56 }
  0x19   : > { %v479_v0 = vld [vmem:[%s1259_s0] sm:$0xff]  ;;  %vm480_vm0 = vcmask 261120   ;;  %vm482_vm1 = vcmask 253952   ;;  %v1081_v2 = vmov 0.0   ;;  %vm511_vm2 = vcmask 257026  }
  0x1a   : > { %v484_v1 = vld [vmem:[%s1260_s1] sm:$0xf]  ;;  %481 = vst.msk [vmem:[%s1267_s8] sm:$0xff] %vm480_vm0, %v479_v0  ;;  %v485_v4 = vld [vmem:[%s1260_s1 + $0x4] sm:$0xf]  ;;  %vm492_vm3 = vcmask 1041408  }
  0x1b   : > { %483 = vst.msk [vmem:[%s1268_s9] sm:$0x1] %vm482_vm1, %v1081_v2  ;;  %v495_v3 = vrot.slane %v484_v1, 6  ;;  %vm493_vm4 = vcmask 1045508   ;;  %v497_v6 = vrot.slane %v485_v4, 6  ;;  %vm513_vm6 = vcmask 257024  }
  0x1c   : > { %vm1198_vm5 = vmor %vm492_vm3, %vm493_vm4  ;;  %v486_v7 = vld [vmem:[%s1260_s1 + $0x8] sm:$0xf]  ;;  %v487_v8 = vld [vmem:[%s1260_s1 + $0xc] sm:$0xf]  ;;  %vm517_vm7 = vcmask 254976  }
  0x1d   : > { %v496_v9 = vrot.slane %v495_v3, 4  ;;  %512 = vst.msk [vmem:[#allocation2] sm:$0xc] %vm511_vm2, %v495_v3  ;;  %v500_v10 = vrot.slane %v486_v7, 6  ;;  %v503_v11 = vrot.slane %v487_v8, 6  ;;  %v499_v12 = vrot.slane %v497_v6, 4 }
  0x1f   : > { %v498_v13 = vsel %vm1198_vm5, %v496_v9, %v497_v6  ;;  %v502_v14 = vrot.slane %v500_v10, 4  ;;  %v505_v15 = vrot.slane %v503_v11, 4  ;;  %v501_v16 = vsel %vm1198_vm5, %v499_v12, %v500_v10 }
  0x20   : > { %514 = vst.msk [vmem:[#allocation2 + $0x4] sm:$0xf] %vm513_vm6, %v498_v13  ;;  %515 = vst.msk [vmem:[#allocation2 + $0x8] sm:$0xf] %vm513_vm6, %v501_v16 }
  0x21   : > { %v504_v17 = vsel %vm1198_vm5, %v502_v14, %v503_v11  ;;  %518 = vst.msk [vmem:[#allocation2 + $0x10] sm:$0x3] %vm517_vm7, %v505_v15 }
  0x22   : > { %516 = vst.msk [vmem:[#allocation2 + $0xc] sm:$0xf] %vm513_vm6, %v504_v17 }
  0x23 PF: > { %v520_v18 = vld [vmem:[%s1267_s8] sm:$0xff]  ;;  %vm532_vm8 = vcmask 1043456   ;;  %v1082_v19 = vmov 0.0   ;;  %vm1083_vm9 = vmmov 0   ;;  %vm528_vm10 = vcmask 64512   ;;  %v590_v25 = vld [vmem:[%s1171_s29 + $0x10] sm:$0xff] }
  0x24   : > { %987 = vmatprep.subr.bf16.mxu0 %v1082_v19  ;;  %v521_v20 = vpack.c.bf16 %v520_v18, %v520_v18  ;;  %989 = vmatprep.mubr.msk.bf16.mxu0 %vm1083_vm9, %v1082_v19  ;;  %v522_v21 = vld [vmem:[%s1161_s21] sm:$0xff]  ;;  %v1084_v23 = vmov 0   ;;  %v589_v26 = vld [vmem:[%s1171_s29 + $0x8] sm:$0xff]  ;;  %vm644_vm11 = vcmask 1041408   ;;  %vm637_vm12 = vcmask 293888   ;;  %v591_v31 = vld [vmem:[%s1171_s29 + $0x18] sm:$0xff] }
  0x25   : > { %v519_v22 = vld [vmem:[%s1156_s18] sm:$0xf]  ;;  %1040 = vset.pattern.permute.xlu0 %v1084_v23  ;;  %1041 = vset.pattern.permute.xlu1 %v1084_v23  ;;  %vm754_vm13 = vcmask 257024   ;;  %vm577_vm14 = vcmask 254976   ;;  %v1046_v42 = vld [vmem:[%s1166_s26 + $0x8] sm:$0xff]   ;;  %vm710_vm15 = vcmask 261120  }
  0x26   : > { %v534_v24 = vsel %vm532_vm8, %v521_v20, 0  ;;  %525 = vperm.xlu0 %1040, %v522_v21   ;;  %v1045_v30 = vld [vmem:[%s1166_s26] sm:$0xff]   ;;  %609 = vperm.xlu1 %1041, %v591_v31   ;;  %vm774_vm0 = vcmask 253952   ;;  %vm763_vm1 = vcmask 261124  }
  0x27   : > { %988 = vmatpush3.bf16.msra.mxu0 %v534_v24  ;;  %999 = vmatprep.mubr.msk.bf16.mxu1 %vm637_vm12, %v1045_v30  ;;  %v588_v32 = vld [vmem:[%s1171_s29] sm:$0xff] }
  0x28   : > { %1003 = vmatprep.subr.bf16.mxu0 %v1082_v19  ;;  %v1042_v27 = vld [vmem:[#allocation2 + $0x10] ss:$0 sps:$4 sm:$0x33]   ;;  %v704_v33 = vld [vmem:[%s1181_s3] sm:$0xff] }
  0x29   : > { %1011 = vmatprep.subr.msk.bf16.mxu1 %vm644_vm11, %v1042_v27  ;;  %v646_v28 = vsel %vm644_vm11, %v1042_v27, 0  ;;  %v1043_v29 = vld [vmem:[#allocation2 + $0x8] sm:$0xff]   ;;  %v701_v61 = vld [vmem:[%s1176_s2] sm:$0xf] }
  0x2a   : > { %990 = vmatmul.mubr.msk.bf16.vlgmr.msra.gmra.mxu0 %vm528_vm10, %v519_v22  ;;  %604 = vperm.xlu0 %1040, %v590_v25   ;;  %v765_v11 = vld [vmem:[%s1268_s9] sm:$0x1] }
  0x2b   : > { %1007 = vmatprep.mubr.msk.bf16.mxu0 %vm1083_vm9, %v1082_v19  ;;  %994 = vmatpush3.bf16.msra.mxu1 %v646_v28 }
  0x2c   : > { %995 = vmatprep.subr.bf16.mxu1 %v1043_v29  ;;  %594 = vperm.xlu1 %1041, %v588_v32  }
  0x2e   : > { %599 = vperm.xlu0 %1040, %v589_v26  }
  0x2f   : > { %996 = vmatpush3.bf16.msra.mxu1 %v1043_v29 }
  0x30   : > { %707 = vperm.xlu1 %1041, %v704_v33  }
  0xa1   : > { %v526_v34 = vpop.permute.xlu0 %525  ;;  %v610_v44 = vpop.permute.xlu1 %609 }
  0xa5   : > { %v605_v43 = vpop.permute.xlu0 %604 }
  0xa7   : > { %v595_v51 = vpop.permute.xlu1 %594 }
  0xa9   : > { %v600_v49 = vpop.permute.xlu0 %599 }
  0xab   : > { %v708_v62 = vpop.permute.xlu1 %707 }
  0xea   : > { %v570_v35 = vpop.f32.mrf.mxu0 }
  0xeb   : > { %v571_v36 = vadd.f32 %v570_v35, %v526_v34 }
  0xec   : > { %v991_v37 = vpop.f32.mrf.mxu0 }
  0xed   : > { %v576_v38 = vpack.c.bf16 %v571_v36, %v571_v36  ;;  %755 = vst.msk [vmem:[%s1267_s8] sm:$0xf] %vm754_vm13, %v571_v36 }
  0xee   : > { %v573_v39 = vpop.f32.mrf.mxu0 }
  0xef   : > { %578 = vst.msk [vmem:[#allocation2] sm:$0x3] %vm577_vm14, %v576_v38 }
  0xf0   : > { %v992_v40 = vpop.f32.mrf.mxu0 }
  0xf6   : > { %v1044_v41 = vld [vmem:[#allocation2] sm:$0xff]  }
  0xf7   : > { %997 = vmatprep.subr.bf16.mxu1 %v1044_v41 }
  0xf8   : > { %998 = vmatpush3.bf16.msra.mxu1 %v1044_v41 }
  0xfb   : > { %1000 = vmatmul.mubr.msk.bf16.vlgmr.msra.gmra.mxu1 %vm637_vm12, %v1046_v42 }
 0x1bb   : > { %v1001_v45 = vpop.f32.mrf.mxu1 }
 0x1bc   : > { %v691_v46 = vadd.f32 %v1001_v45, %v605_v43 }
 0x1bd   : > { %v682_v47 = vpop.f32.mrf.mxu1 }
 0x1be   : > { %1047 = vtanh.f32 %v691_v46  ;;  %v683_v53 = vadd.f32 %v682_v47, %v595_v51 }
 0x1bf   : > { %v1002_v48 = vpop.f32.mrf.mxu1 }
 0x1c0   : > { %v694_v50 = vadd.f32 %v1002_v48, %v610_v44 }
 0x1c1   : > { %v685_v52 = vpop.f32.mrf.mxu1 }
 0x1c2   : > { %1049 = vtanh.f32 %v694_v50  ;;  %v686_v54 = vadd.f32 %v685_v52, %v600_v49 }
 0x1c4   : > { %1051 = vtanh.f32 %v686_v54 }
 0x1c5   : > { %1053 = vtanh.f32 %v683_v53 }
 0x1cb   : > { %v1048_v55 = vpop.eup %1047 }
 0x1cf   : > { %v1050_v56 = vpop.eup %1049 }
 0x1d0   : > { %v703_v57 = vpack.c.bf16 %v1050_v56, %v1048_v55 }
 0x1d1   : > { %v1052_v58 = vpop.eup %1051 }
 0x1d2   : > { %1004 = vmatpush3.bf16.msra.mxu0 %v703_v57  ;;  %v1054_v59 = vpop.eup %1053 }
 0x1d3   : > { %1005 = vmatprep.subr.bf16.mxu0 %v1082_v19  ;;  %v702_v60 = vpack.c.bf16 %v1052_v58, %v1054_v59 }
 0x1d6   : > { %1006 = vmatpush3.bf16.msra.mxu0 %v702_v60 }
 0x1d9   : > { %1008 = vmatmul.mubr.msk.bf16.vlgmr.msra.gmra.mxu0 %vm710_vm15, %v701_v61 }
 0x299   : > { %v748_v63 = vpop.f32.mrf.mxu0 }
 0x29a   : > { %v749_v0 = vadd.f32 %v748_v63, %v708_v62 }
 0x29b   : > { %v1009_v1 = vpop.f32.mrf.mxu0 }
 0x29c   : > { %v756_v2 = vmul.f32 1.442695, %v749_v0  ;;  %v766_v3 = vsel %vm754_vm13, %v749_v0, 0.0 }
 0x29d   : > { %v767_v4 = vrot.slane %v766_v3, 4  ;;  %v751_v5 = vpop.f32.mrf.mxu0 }
 0x29e   : > { %1055 = vpow2.f32 %v756_v2 }
 0x29f   : > { %v768_v6 = vadd.f32 %v767_v4, %v766_v3  ;;  %v1010_v7 = vpop.f32.mrf.mxu0 }
 0x2a1   : > { %v769_v8 = vrot.slane %v768_v6, 2 }
 0x2a3   : > { %v770_v9 = vadd.f32 %v769_v8, %v768_v6 }
 0x2a5   : > { %v771_v10 = vrot.slane %v770_v9, 1 }
 0x2a7   : > { %v772_v12 = vadd.f32 %v771_v10, %v770_v9 }
 0x2a9   : > { %v773_v13 = vadd.f32 %v772_v12, %v765_v11 }
 0x2ab   : > { %v1056_v14 = vpop.eup %1055  ;;  %775 = vst.msk [vmem:[%s1268_s9] sm:$0x1] %vm774_vm0, %v773_v13 }
 0x2ac   : > { %v759_v15 = vrot.slane %v1056_v14, 4 }
 0x2ae   : > { %v761_v16 = vmul.f32 %v759_v15, %v571_v36 }
 0x2b0   : > { %v762_v17 = vadd.f32 %v761_v16, %v749_v0 }
 0x2b2   : > { %764 = vst.msk [vmem:[%s1267_s8] sm:$0xf0] %vm763_vm1, %v762_v17 }
 0x2b3 PF: > { %s20_s11 = sadd.s32 1, %s1079_s11   ;;  %s1275_s30 = smov %s1075_s10 }
 0x2b4   : > { %p17_p6 = scmp.ge.s32.totalorder %s20_s11, 4   ;;  %s1276_s10 = smov %s1278_s12 }
 0x2b6   :  { %19 = sbr.rel (!%p17_p6) target bundleno = 3 (0x3), region = 119 }

// kernel: flow_aff_conv_act_forward.5
= control target key start
LH: loop header
LB: loop body
LE: loop exit
PB: predicated region body
PF: predicated region fallthrough
CT: control target
= control target key end

     0   :  { %s1263_s30 = smov 0   ;;  %s1265_s10 = smov 0   ;;  %s1420_s0 = inlined_call_operand.vmem [shape: f32[24,32], index: 0, kind: input, shape index: {}]   ;;  %s1421_s1 = inlined_call_operand.vmem [shape: bf16[32,32], index: 1, kind: input, shape index: {}]   ;;  %s1422_s2 = inlined_call_operand.vmem [shape: bf16[2,24,24], index: 2, kind: input, shape index: {}]   ;;  %s1423_s3 = inlined_call_operand.vmem [shape: f32[2,24,1], index: 3, kind: input, shape index: {}]   ;;  %s1424_s4 = inlined_call_operand.vmem [shape: bf16[2,32,44], index: 4, kind: input, shape index: {}]   ;;  %s1425_s5 = inlined_call_operand.vmem [shape: f32[2,32,1], index: 5, kind: input, shape index: {}]   ;;  %s1426_s6 = inlined_call_operand.vmem [shape: bf16[2,24,32], index: 6, kind: input, shape index: {}]   ;;  %s1427_s7 = inlined_call_operand.vmem [shape: f32[2,24,1], index: 7, kind: input, shape index: {}]   ;;  %s1428_s8 = inlined_call_operand.vmem [shape: f32[24,32], index: 8, kind: output, shape index: {0}]   ;;  %s1429_s9 = inlined_call_operand.vmem [shape: f32[1,32], index: 9, kind: output, shape index: {1}]  }
   0x1   :  { %s1267_s11 = smov 0  }
   0x2 LB: > { %s29_s12 = sadd.s32 1, %s1205_s10  ;;  %p1060_p0 = scmp.ge.s32.totalorder %s1209_s11, 1  ;;  %s1209_s11 = sphi %s1267_s11, %s20_s11   ;;  %s1205_s10 = sphi %s1265_s10, %s1433_s10   ;;  %s1201_s30 = sphi %s1263_s30, %s1432_s30  }
   0x3   : > { %p30_p1 = scmp.ge.s32.totalorder %s29_s12, 2  ;;  %p370_p2 = scmp.lt.s32.totalorder %s1209_s11, 3 }
   0x5   : > { %s1435_s12 = smov (%p30_p1, %s29_s12), 0  ;;  %p371_p3 = pnand %p1060_p0, %p370_p2 }
   0x6   : > { %1430 = sst [smem:[#allocation3_spill]] %s1435_s12  ;;  %p449_p4 = scmp.lt.s32.totalorder (!%p371_p3), %s1201_s30, 1 }
   0x7   : > { %374 = sbr.rel (%p371_p3) target bundleno = 709 (0x2c5), region = 52  ;;  %p1069_p5 = scmp.ne.s32.totalorder (!%p371_p3), %s1201_s30, 0 }
   0xc   : > { %s450_s13 = scalar_select %p449_p4, %s1201_s30, 1 }
   0xe   : > { %s1136_s14 = smul.u32 12, %s450_s13  ;;  %s1091_s15 = sshll.u32 %s450_s13, 4 }
   0xf   : > { %s1137_s16 = smul.u32 24, %s450_s13  ;;  %s1284_s19 = scalar_lea.vmem %s1424_s4, %s1091_s15 }
  0x10   : > { %s1289_s22 = scalar_lea.vmem %s1422_s2, %s1136_s14  ;;  %s1092_s23 = sshll.u32 %s450_s13, 5 }
  0x11   : > { %s1294_s26 = scalar_lea.vmem %s1423_s3, %s1137_s16  ;;  %s1299_s29 = scalar_lea.vmem %s1425_s5, %s1092_s23 }
  0x12   : > { %s1304_s15 = scalar_lea.vmem %s1426_s6, %s1136_s14  ;;  %s1309_s21 = scalar_lea.vmem %s1427_s7, %s1137_s16 }
  0x13   : > { %490 = sbr.rel (%p1069_p5) target bundleno = 35 (0x23), region = 56 }
  0x18   : > { %v491_v0 = vld [vmem:[%s1420_s0] sm:$0xff]  ;;  %vm494_vm0 = vcmask 261120   ;;  %v492_v1 = vld [vmem:[%s1420_s0 + $0x8] sm:$0xff]  ;;  %v493_v2 = vld [vmem:[%s1420_s0 + $0x10] sm:$0xff]  ;;  %vm498_vm1 = vcmask 253952   ;;  %v1211_v3 = vmov 0.0  }
  0x19   : > { %495 = vst.msk [vmem:[%s1428_s8] sm:$0xff] %vm494_vm0, %v491_v0  ;;  %496 = vst.msk [vmem:[%s1428_s8 + $0x8] sm:$0xff] %vm494_vm0, %v492_v1  ;;  %v500_v4 = vld [vmem:[%s1421_s1] sm:$0xf]  ;;  %vm527_vm2 = vcmask 257026   ;;  %vm508_vm3 = vcmask 1041408  }
  0x1a   : > { %497 = vst.msk [vmem:[%s1428_s8 + $0x10] sm:$0xff] %vm494_vm0, %v493_v2  ;;  %v501_v5 = vld [vmem:[%s1421_s1 + $0x4] sm:$0xf]  ;;  %v511_v6 = vrot.slane %v500_v4, 6  ;;  %vm509_vm4 = vcmask 1045508   ;;  %vm529_vm6 = vcmask 257024  }
  0x1b   : > { %499 = vst.msk [vmem:[%s1429_s9] sm:$0x1] %vm498_vm1, %v1211_v3  ;;  %v513_v7 = vrot.slane %v501_v5, 6  ;;  %v502_v8 = vld [vmem:[%s1421_s1 + $0x8] sm:$0xf]  ;;  %vm510_vm5 = vmor %vm508_vm3, %vm509_vm4  ;;  %vm533_vm7 = vcmask 254976  }
  0x1c   : > { %v516_v9 = vrot.slane %v502_v8, 6  ;;  %v503_v10 = vld [vmem:[%s1421_s1 + $0xc] sm:$0xf]  ;;  %v512_v11 = vrot.slane %v511_v6, 4  ;;  %528 = vst.msk [vmem:[#allocation2 + $0x4] sm:$0xc] %vm527_vm2, %v511_v6 }
  0x1d   : > { %v515_v12 = vrot.slane %v513_v7, 4  ;;  %v519_v13 = vrot.slane %v503_v10, 6 }
  0x1e   : > { %v518_v14 = vrot.slane %v516_v9, 4  ;;  %v514_v15 = vsel %vm510_vm5, %v512_v11, %v513_v7 }
  0x1f   : > { %v517_v16 = vsel %vm510_vm5, %v515_v12, %v516_v9  ;;  %v521_v17 = vrot.slane %v519_v13, 4  ;;  %530 = vst.msk [vmem:[#allocation2 + $0x8] sm:$0xf] %vm529_vm6, %v514_v15 }
  0x20   : > { %531 = vst.msk [vmem:[#allocation2 + $0xc] sm:$0xf] %vm529_vm6, %v517_v16  ;;  %v520_v18 = vsel %vm510_vm5, %v518_v14, %v519_v13 }
  0x21   : > { %532 = vst.msk [vmem:[#allocation2 + $0x10] sm:$0xf] %vm529_vm6, %v520_v18 }
  0x22   : > { %534 = vst.msk [vmem:[#allocation2 + $0x14] sm:$0x3] %vm533_vm7, %v521_v17 }
  0x23 PF: > { %v540_v19 = vld [vmem:[%s1428_s8 + $0x10] sm:$0xff]  ;;  %vm576_vm8 = vcmask 1043456   ;;  %v538_v20 = vld [vmem:[%s1428_s8] sm:$0xff]  ;;  %v539_v21 = vld [vmem:[%s1428_s8 + $0x8] sm:$0xff]  ;;  %vm569_vm9 = vcmask 195584   ;;  %v1212_v25 = vmov 0  }
  0x24   : > { %v542_v22 = vpack.c.bf16 %v540_v19, %v540_v19  ;;  %v541_v23 = vpack.c.bf16 %v539_v21, %v538_v20  ;;  %v1166_v24 = vld [vmem:[%s1289_s22] sm:$0xff]   ;;  %1164 = vset.pattern.permute.xlu0 %v1212_v25  ;;  %1165 = vset.pattern.permute.xlu1 %v1212_v25  ;;  %v544_v28 = vld [vmem:[%s1294_s26 + $0x8] sm:$0xff]  ;;  %v545_v32 = vld [vmem:[%s1294_s26 + $0x10] sm:$0xff]  ;;  %vm708_vm10 = vcmask 1045504   ;;  %vm701_vm11 = vcmask 359424  }
  0x25   : > { %v543_v26 = vld [vmem:[%s1294_s26] sm:$0xff]  ;;  %1112 = vmatprep.mubr.msk.bf16.mxu0 %vm569_vm9, %v1166_v24  ;;  %v1167_v29 = vld [vmem:[%s1289_s22 + $0x8] ss:$0 sps:$4 sm:$0xff]   ;;  %v652_v37 = vld [vmem:[%s1299_s29 + $0x10] sm:$0xff]  ;;  %vm796_vm12 = vcmask 261120   ;;  %vm636_vm13 = vcmask 257024  }
  0x26   : > { %1134 = vmatprep.subr.msk.bf16.mxu0 %vm576_vm8, %v542_v22  ;;  %v578_v27 = vsel %vm576_vm8, %v542_v22, 0  ;;  %548 = vperm.xlu0 %1164, %v543_v26   ;;  %v650_v30 = vld [vmem:[%s1299_s29] sm:$0xff]  ;;  %v653_v38 = vld [vmem:[%s1299_s29 + $0x18] sm:$0xff]  ;;  %v651_v39 = vld [vmem:[%s1299_s29 + $0x8] sm:$0xff]  ;;  %vm638_vm14 = vcmask 254976   ;;  %vm882_vm15 = vcmask 253952  }
  0x27   : > { %1109 = vmatpush3.bf16.msra.mxu0 %v578_v27  ;;  %v770_v31 = vld [vmem:[%s1309_s21] sm:$0xff]  ;;  %v1169_v34 = vld [vmem:[#allocation2 + $0x8] sm:$0xff]   ;;  %666 = vperm.xlu1 %1165, %v652_v37   ;;  %v772_v41 = vld [vmem:[%s1309_s21 + $0x10] sm:$0xff]  ;;  %vm868_vm0 = vcmask 261124  }
  0x28   : > { %1110 = vmatprep.subr.bf16.mxu0 %v541_v23  ;;  %v1171_v36 = vld [vmem:[%s1284_s19] sm:$0xff]   ;;  %v771_v40 = vld [vmem:[%s1309_s21 + $0x8] sm:$0xff] }
  0x29   : > { %v1168_v33 = vld [vmem:[#allocation2 + $0x10] sm:$0x3f]   ;;  %1122 = vmatprep.mubr.msk.bf16.mxu1 %vm701_vm11, %v1171_v36  ;;  %v1172_v53 = vld [vmem:[%s1284_s19 + $0x8] sm:$0xff]   ;;  %v1173_v54 = vld [vmem:[%s1304_s15] sm:$0xff]  }
  0x2a   : > { %553 = vperm.xlu0 %1164, %v544_v28   ;;  %1135 = vmatprep.subr.msk.bf16.mxu1 %vm708_vm10, %v1168_v33  ;;  %v710_v35 = vsel %vm708_vm10, %v1168_v33, 0  ;;  %v1174_v9 = vld [vmem:[%s1304_s15 + $0x8] ss:$0 sps:$4 sm:$0xff]  }
  0x2b   : > { %1111 = vmatpush3.bf16.msra.mxu0 %v541_v23  ;;  %1117 = vmatpush3.bf16.msra.mxu1 %v710_v35 }
  0x2c   : > { %1118 = vmatprep.subr.bf16.mxu1 %v1169_v34  ;;  %671 = vperm.xlu1 %1165, %v653_v38  }
  0x2e   : > { %1113 = vmatmul.mubr.msk.bf16.vlgmr.msra.gmra.mxu0 %vm569_vm9, %v1167_v29  ;;  %656 = vperm.xlu0 %1164, %v650_v30   ;;  %v871_v30 = vld [vmem:[%s1429_s9] sm:$0x1] }
  0x2f   : > { %1119 = vmatpush3.bf16.msra.mxu1 %v1169_v34  ;;  %1130 = vmatprep.mubr.msk.bf16.mxu0 %vm796_vm12, %v1173_v54 }
  0x30   : > { %661 = vperm.xlu1 %1165, %v651_v39  }
  0x32   : > { %775 = vperm.xlu0 %1164, %v770_v31  }
  0x34   : > { %780 = vperm.xlu1 %1165, %v771_v40  }
  0x36   : > { %558 = vperm.xlu0 %1164, %v545_v32  }
  0x38   : > { %785 = vperm.xlu1 %1165, %v772_v41  }
  0xa1   : > { %v549_v42 = vpop.permute.xlu0 %548 }
  0xa2   : > { %v667_v55 = vpop.permute.xlu1 %666 }
  0xa5   : > { %v554_v48 = vpop.permute.xlu0 %553 }
  0xa7   : > { %v672_v56 = vpop.permute.xlu1 %671 }
  0xa9   : > { %v657_v60 = vpop.permute.xlu0 %656 }
  0xab   : > { %v662_v0 = vpop.permute.xlu1 %661 }
  0xad   : > { %v776_v11 = vpop.permute.xlu0 %775 }
  0xaf   : > { %v781_v16 = vpop.permute.xlu1 %780 }
  0xb1   : > { %v559_v32 = vpop.permute.xlu0 %558 }
  0xb3   : > { %v786_v39 = vpop.permute.xlu1 %785 }
  0xee   : > { %v1371_v43 = vpop.f32.mrf.mxu0 }
  0xef   : > { %v623_v38 = vadd.f32 %v1371_v43, %v559_v32 }
  0xf0   : > { %v614_v44 = vpop.f32.mrf.mxu0 }
  0xf1   : > { %v615_v45 = vadd.f32 %v614_v44, %v549_v42 }
  0xf2   : > { %v1115_v46 = vpop.f32.mrf.mxu0 }
  0xf3   : > { %v1093_v47 = vpack.c.bf16 %v615_v45, %v615_v45  ;;  %851 = vst.msk [vmem:[%s1428_s8] sm:$0xff] %vm796_vm12, %v615_v45 }
  0xf4   : > { %v617_v49 = vpop.f32.mrf.mxu0 }
  0xf5   : > { %637 = vst.msk [vmem:[#allocation2] sm:$0xf] %vm636_vm13, %v1093_v47  ;;  %v1378_v50 = vadd.f32 %v617_v49, %v554_v48 }
  0xf7   : > { %v1094_v51 = vpack.c.bf16 %v1378_v50, %v1378_v50  ;;  %852 = vst.msk [vmem:[%s1428_s8 + $0x8] sm:$0xf] %vm636_vm13, %v1378_v50 }
  0xf9   : > { %639 = vst.msk [vmem:[#allocation2 + $0x4] sm:$0x3] %vm638_vm14, %v1094_v51 }
 0x100   : > { %v1170_v52 = vld [vmem:[#allocation2] sm:$0xff]  }
 0x101   : > { %1120 = vmatprep.subr.bf16.mxu1 %v1170_v52 }
 0x102   : > { %1121 = vmatpush3.bf16.msra.mxu1 %v1170_v52 }
 0x105   : > { %1123 = vmatmul.mubr.msk.bf16.vlgmr.msra.gmra.mxu1 %vm701_vm11, %v1172_v53 }
 0x1c5   : > { %v1124_v57 = vpop.f32.mrf.mxu1 }
 0x1c6   : > { %v755_v58 = vadd.f32 %v1124_v57, %v667_v55 }
 0x1c7   : > { %v746_v59 = vpop.f32.mrf.mxu1 }
 0x1c8   : > { %v747_v61 = vadd.f32 %v746_v59, %v657_v60  ;;  %1175 = vtanh.f32 %v755_v58 }
 0x1c9   : > { %v1125_v62 = vpop.f32.mrf.mxu1 }
 0x1ca   : > { %v758_v63 = vadd.f32 %v1125_v62, %v672_v56 }
 0x1cb   : > { %v749_v1 = vpop.f32.mrf.mxu1 }
 0x1cc   : > { %1177 = vtanh.f32 %v758_v63  ;;  %v750_v2 = vadd.f32 %v749_v1, %v662_v0 }
 0x1cd   : > { %1179 = vtanh.f32 %v747_v61 }
 0x1ce   : > { %1181 = vtanh.f32 %v750_v2 }
 0x1d5   : > { %v1176_v3 = vpop.eup %1175 }
 0x1d9   : > { %v1178_v4 = vpop.eup %1177 }
 0x1da   : > { %v1180_v5 = vpop.eup %1179  ;;  %v769_v6 = vpack.c.bf16 %v1178_v4, %v1176_v3 }
 0x1db   : > { %v1182_v7 = vpop.eup %1181 }
 0x1dc   : > { %1126 = vmatprep.subr.bf16.mxu0 %v769_v6  ;;  %v768_v8 = vpack.c.bf16 %v1182_v7, %v1180_v5 }
 0x1dd   : > { %1127 = vmatpush3.bf16.msra.mxu0 %v769_v6 }
 0x1de   : > { %1128 = vmatprep.subr.bf16.mxu0 %v768_v8 }
 0x1e1   : > { %1129 = vmatpush3.bf16.msra.mxu0 %v768_v8 }
 0x1e4   : > { %1131 = vmatmul.mubr.msk.bf16.vlgmr.msra.gmra.mxu0 %vm796_vm12, %v1174_v9 }
 0x2a4   : > { %v1132_v10 = vpop.f32.mrf.mxu0 }
 0x2a5   : > { %v846_v41 = vadd.f32 %v1132_v10, %v786_v39 }
 0x2a6   : > { %v837_v12 = vpop.f32.mrf.mxu0 }
 0x2a7   : > { %v838_v13 = vadd.f32 %v837_v12, %v776_v11 }
 0x2a8   : > { %v1133_v14 = vpop.f32.mrf.mxu0 }
 0x2a9   : > { %v853_v15 = vmul.f32 1.442695, %v838_v13  ;;  %v872_v19 = vsel %vm796_vm12, %v838_v13, 0.0 }
 0x2aa   : > { %v840_v17 = vpop.f32.mrf.mxu0 }
 0x2ab   : > { %1183 = vpow2.f32 %v853_v15  ;;  %v841_v18 = vadd.f32 %v840_v17, %v781_v16 }
 0x2ad   : > { %v855_v20 = vmul.f32 1.442695, %v841_v18  ;;  %v873_v21 = vsel %vm636_vm13, %v841_v18, 0.0 }
 0x2ae   : > { %v874_v22 = vadd.f32 %v873_v21, %v872_v19 }
 0x2af   : > { %1185 = vpow2.f32 %v855_v20 }
 0x2b0   : > { %v875_v23 = vrot.slane %v874_v22, 4 }
 0x2b2   : > { %v876_v24 = vadd.f32 %v875_v23, %v874_v22 }
 0x2b4   : > { %v877_v25 = vrot.slane %v876_v24, 2 }
 0x2b6   : > { %v878_v26 = vadd.f32 %v877_v25, %v876_v24 }
 0x2b8   : > { %v1184_v27 = vpop.eup %1183  ;;  %v879_v28 = vrot.slane %v878_v26, 1 }
 0x2b9   : > { %v859_v29 = vrot.slane %v1184_v27, 4 }
 0x2ba   : > { %v880_v31 = vadd.f32 %v879_v28, %v878_v26 }
 0x2bb   : > { %v864_v33 = vmul.f32 %v859_v29, %v1378_v50 }
 0x2bc   : > { %v1186_v34 = vpop.eup %1185  ;;  %v881_v35 = vadd.f32 %v880_v31, %v871_v30 }
 0x2bd   : > { %v860_v36 = vrot.slane %v1186_v34, 4  ;;  %v866_v37 = vadd.f32 %v864_v33, %v841_v18 }
 0x2be   : > { %883 = vst.msk [vmem:[%s1429_s9] sm:$0x1] %vm882_vm15, %v881_v35 }
 0x2bf   : > { %v861_v40 = vsel %vm576_vm8, %v859_v29, %v860_v36  ;;  %869 = vst.msk [vmem:[%s1428_s8 + $0x8] sm:$0xf0] %vm868_vm0, %v866_v37 }
 0x2c0   : > { %v865_v42 = vmul.f32 %v861_v40, %v623_v38 }
 0x2c2   : > { %v867_v44 = vadd.f32 %v865_v42, %v846_v41 }
 0x2c4   : > { %870 = vst.msk [vmem:[%s1428_s8 + $0x10] sm:$0xff] %vm796_vm12, %v867_v44 }
 0x2c5 PF: > { %s20_s11 = sadd.s32 1, %s1209_s11   ;;  %s1431_s16 = sld [smem:[#allocation3_spill]] }
 0x2c6   : > { %p17_p6 = scmp.ge.s32.totalorder %s20_s11, 4   ;;  %s1432_s30 = smov %s1205_s10 }
 0x2c8   :  { %19 = sbr.rel (!%p17_p6) target bundleno = 2 (0x2), region = 119 }
 0x2cb   : > { %s1433_s10 = smov %s1431_s16 }

// kernel: flow_aff_conv_act_forward.6
= control target key start
LH: loop header
LB: loop body
LE: loop exit
PB: predicated region body
PF: predicated region fallthrough
CT: control target
= control target key end

     0   :  { %s1153_s30 = smov 0   ;;  %s1155_s10 = smov 0   ;;  %s1278_s0 = inlined_call_operand.vmem [shape: f32[16,32], index: 0, kind: input, shape index: {}]   ;;  %s1279_s1 = inlined_call_operand.vmem [shape: bf16[32,32], index: 1, kind: input, shape index: {}]   ;;  %s1280_s2 = inlined_call_operand.vmem [shape: bf16[2,16,16], index: 2, kind: input, shape index: {}]   ;;  %s1281_s3 = inlined_call_operand.vmem [shape: f32[2,16,1], index: 3, kind: input, shape index: {}]   ;;  %s1282_s4 = inlined_call_operand.vmem [shape: bf16[2,32,40], index: 4, kind: input, shape index: {}]   ;;  %s1283_s5 = inlined_call_operand.vmem [shape: f32[2,32,1], index: 5, kind: input, shape index: {}]   ;;  %s1284_s6 = inlined_call_operand.vmem [shape: bf16[2,16,32], index: 6, kind: input, shape index: {}]   ;;  %s1285_s7 = inlined_call_operand.vmem [shape: f32[2,16,1], index: 7, kind: input, shape index: {}]   ;;  %s1286_s8 = inlined_call_operand.vmem [shape: f32[16,32], index: 8, kind: output, shape index: {0}]   ;;  %s1287_s9 = inlined_call_operand.vmem [shape: f32[1,32], index: 9, kind: output, shape index: {1}]  }
   0x1   :  { %1288 = sst [smem:[#allocation3_spill]] %s1280_s2  ;;  %s1157_s11 = smov 0  }
   0x2 LB: > { %s29_s12 = sadd.s32 1, %s1093_s10  ;;  %p958_p0 = scmp.ge.s32.totalorder %s1097_s11, 1  ;;  %s1097_s11 = sphi %s1157_s11, %s20_s11   ;;  %s1093_s10 = sphi %s1155_s10, %s1291_s10   ;;  %s1089_s30 = sphi %s1153_s30, %s1290_s30  }
   0x3   : > { %p30_p1 = scmp.ge.s32.totalorder %s29_s12, 2  ;;  %p370_p2 = scmp.lt.s32.totalorder %s1097_s11, 3 }
   0x5   : > { %s1293_s12 = smov (%p30_p1, %s29_s12), 0  ;;  %p371_p3 = pnand %p958_p0, %p370_p2 }
   0x6   : > { %p449_p4 = scmp.lt.s32.totalorder (!%p371_p3), %s1089_s30, 1  ;;  %s1289_s2 = sld [smem:[#allocation3_spill]] (!%p371_p3) }
   0x7   : > { %374 = sbr.rel (%p371_p3) target bundleno = 684 (0x2ac), region = 52  ;;  %p971_p5 = scmp.ne.s32.totalorder (!%p371_p3), %s1089_s30, 0 }
   0xc   : > { %s450_s13 = scalar_select %p449_p4, %s1089_s30, 1 }
   0xe   : > { %s987_s14 = sshll.u32 %s450_s13, 3  ;;  %s988_s15 = sshll.u32 %s450_s13, 4 }
   0xf   : > { %s1174_s18 = scalar_lea.vmem %s1289_s2, %s987_s14  ;;  %s1179_s21 = scalar_lea.vmem %s1281_s3, %s988_s15 }
  0x10   : > { %s1184_s24 = scalar_lea.vmem %s1282_s4, %s988_s15  ;;  %s990_s25 = sshll.u32 %s450_s13, 5 }
  0x11   : > { %s1189_s28 = scalar_lea.vmem %s1283_s5, %s990_s25  ;;  %s1194_s17 = scalar_lea.vmem %s1284_s6, %s987_s14 }
  0x12   : > { %s1199_s20 = scalar_lea.vmem %s1285_s7, %s988_s15  ;;  %490 = sbr.rel (%p971_p5) target bundleno = 28 (0x1c), region = 56 }
  0x17   : > { %v491_v0 = vld [vmem:[%s1278_s0] sm:$0xff]  ;;  %vm493_vm0 = vcmask 261120   ;;  %v492_v1 = vld [vmem:[%s1278_s0 + $0x8] sm:$0xff]  ;;  %vm496_vm1 = vcmask 253952   ;;  %vm502_vm2 = vcmask 257024   ;;  %v1099_v2 = vmov 0.0  }
  0x18   : > { %494 = vst.msk [vmem:[%s1286_s8] sm:$0xff] %vm493_vm0, %v491_v0  ;;  %495 = vst.msk [vmem:[%s1286_s8 + $0x8] sm:$0xff] %vm493_vm0, %v492_v1  ;;  %v498_v3 = vld [vmem:[%s1279_s1] sm:$0xf]  ;;  %v499_v4 = vld [vmem:[%s1279_s1 + $0x4] sm:$0xf] }
  0x19   : > { %497 = vst.msk [vmem:[%s1287_s9] sm:$0x1] %vm496_vm1, %v1099_v2  ;;  %v500_v5 = vld [vmem:[%s1279_s1 + $0x8] sm:$0xf]  ;;  %v501_v6 = vld [vmem:[%s1279_s1 + $0xc] sm:$0xf] }
  0x1a   : > { %503 = vst.msk [vmem:[#allocation2 + $0x4] sm:$0xf] %vm502_vm2, %v498_v3  ;;  %504 = vst.msk [vmem:[#allocation2 + $0x8] sm:$0xf] %vm502_vm2, %v499_v4 }
  0x1b   : > { %505 = vst.msk [vmem:[#allocation2 + $0xc] sm:$0xf] %vm502_vm2, %v500_v5  ;;  %506 = vst.msk [vmem:[#allocation2 + $0x10] sm:$0xf] %vm502_vm2, %v501_v6 }
  0x1c PF: > { %v1100_v9 = vmov 0.0   ;;  %vm1101_vm3 = vmmov 0   ;;  %v512_v11 = vld [vmem:[%s1179_s21] sm:$0xff]  ;;  %vm529_vm4 = vcmask 130048   ;;  %v1102_v13 = vmov 0   ;;  %v588_v14 = vld [vmem:[%s1189_s28 + $0x10] sm:$0xff] }
  0x1d   : > { %1003 = vmatprep.subr.bf16.mxu0 %v1100_v9  ;;  %1005 = vmatprep.mubr.msk.bf16.mxu0 %vm1101_vm3, %v1100_v9  ;;  %v1058_v12 = vld [vmem:[%s1174_s18] sm:$0xff]   ;;  %v587_v15 = vld [vmem:[%s1189_s28 + $0x8] sm:$0xff]  ;;  %vm642_vm5 = vcmask 1043456   ;;  %vm635_vm6 = vcmask 326656   ;;  %v589_v21 = vld [vmem:[%s1189_s28 + $0x18] sm:$0xff]  ;;  %vm720_vm7 = vcmask 261120  }
  0x1e   : > { %1056 = vset.pattern.permute.xlu0 %v1102_v13  ;;  %1057 = vset.pattern.permute.xlu1 %v1102_v13  ;;  %v513_v16 = vld [vmem:[%s1179_s21 + $0x8] sm:$0xff]  ;;  %v1062_v20 = vld [vmem:[%s1184_s24] sm:$0xff]   ;;  %vm575_vm8 = vcmask 257024   ;;  %vm780_vm9 = vcmask 253952  }
  0x1f   : > { %v509_v7 = vld [vmem:[%s1286_s8] sm:$0xff]  ;;  %v510_v8 = vld [vmem:[%s1286_s8 + $0x8] sm:$0xff]  ;;  %516 = vperm.xlu0 %1056, %v512_v11   ;;  %1015 = vmatprep.mubr.msk.bf16.mxu1 %vm635_vm6, %v1062_v20 }
  0x20   : > { %v511_v10 = vpack.c.bf16 %v510_v8, %v509_v7  ;;  %607 = vperm.xlu1 %1057, %v589_v21   ;;  %v586_v22 = vld [vmem:[%s1189_s28] sm:$0xff]  ;;  %v704_v24 = vld [vmem:[%s1199_s20 + $0x8] sm:$0xff] }
  0x21   : > { %v703_v23 = vld [vmem:[%s1199_s20] sm:$0xff]  ;;  %v1063_v33 = vld [vmem:[%s1184_s24 + $0x8] sm:$0xff]  }
  0x22   : > { %1004 = vmatpush3.bf16.msra.mxu0 %v511_v10  ;;  %v1059_v17 = vld [vmem:[#allocation2 + $0x10] ss:$0 sps:$4 sm:$0xff]   ;;  %v1060_v19 = vld [vmem:[#allocation2 + $0x8] sm:$0xff]   ;;  %v1064_v52 = vld [vmem:[%s1194_s17] sm:$0xff]  }
  0x23   : > { %1019 = vmatprep.subr.bf16.mxu0 %v1100_v9  ;;  %602 = vperm.xlu0 %1056, %v588_v14   ;;  %v644_v18 = vsel %vm642_vm5, %v1059_v17, 0  ;;  %v771_v2 = vld [vmem:[%s1287_s9] sm:$0x1] }
  0x24   : > { %1027 = vmatprep.subr.msk.bf16.mxu1 %vm642_vm5, %v1059_v17  ;;  %592 = vperm.xlu1 %1057, %v586_v22  }
  0x25   : > { %1006 = vmatmul.mubr.msk.bf16.vlgmr.msra.gmra.mxu0 %vm529_vm4, %v1058_v12  ;;  %1010 = vmatpush3.bf16.msra.mxu1 %v644_v18 }
  0x26   : > { %1023 = vmatprep.mubr.msk.bf16.mxu0 %vm1101_vm3, %v1100_v9  ;;  %1011 = vmatprep.subr.bf16.mxu1 %v1060_v19 }
  0x27   : > { %597 = vperm.xlu0 %1056, %v587_v15  }
  0x28   : > { %707 = vperm.xlu1 %1057, %v703_v23  }
  0x29   : > { %1012 = vmatpush3.bf16.msra.mxu1 %v1060_v19 }
  0x2b   : > { %521 = vperm.xlu0 %1056, %v513_v16  }
  0x2c   : > { %712 = vperm.xlu1 %1057, %v704_v24  }
  0x9a   : > { %v517_v25 = vpop.permute.xlu0 %516 }
  0x9b   : > { %v608_v35 = vpop.permute.xlu1 %607 }
  0x9e   : > { %v603_v34 = vpop.permute.xlu0 %602 }
  0x9f   : > { %v593_v42 = vpop.permute.xlu1 %592 }
  0xa2   : > { %v598_v40 = vpop.permute.xlu0 %597 }
  0xa3   : > { %v708_v53 = vpop.permute.xlu1 %707 }
  0xa6   : > { %v522_v4 = vpop.permute.xlu0 %521 }
  0xa7   : > { %v713_v8 = vpop.permute.xlu1 %712 }
  0xe5   : > { %v567_v26 = vpop.f32.mrf.mxu0 }
  0xe6   : > { %v568_v27 = vadd.f32 %v567_v26, %v517_v25 }
  0xe7   : > { %v1007_v28 = vpop.f32.mrf.mxu0 }
  0xe8   : > { %v574_v29 = vpack.c.bf16 %v568_v27, %v568_v27  ;;  %765 = vst.msk [vmem:[%s1286_s8] sm:$0xff] %vm720_vm7, %v568_v27 }
  0xe9   : > { %v570_v30 = vpop.f32.mrf.mxu0 }
  0xea   : > { %576 = vst.msk [vmem:[#allocation2] sm:$0xf] %vm575_vm8, %v574_v29  ;;  %v571_v6 = vadd.f32 %v570_v30, %v522_v4 }
  0xeb   : > { %v1008_v31 = vpop.f32.mrf.mxu0 }
  0xf1   : > { %v1061_v32 = vld [vmem:[#allocation2] sm:$0xff]  }
  0xf2   : > { %1013 = vmatprep.subr.bf16.mxu1 %v1061_v32 }
  0xf3   : > { %1014 = vmatpush3.bf16.msra.mxu1 %v1061_v32 }
  0xf6   : > { %1016 = vmatmul.mubr.msk.bf16.vlgmr.msra.gmra.mxu1 %vm635_vm6, %v1063_v33 }
 0x1b6   : > { %v1017_v36 = vpop.f32.mrf.mxu1 }
 0x1b7   : > { %v689_v37 = vadd.f32 %v1017_v36, %v603_v34 }
 0x1b8   : > { %v680_v38 = vpop.f32.mrf.mxu1 }
 0x1b9   : > { %1065 = vtanh.f32 %v689_v37  ;;  %v681_v44 = vadd.f32 %v680_v38, %v593_v42 }
 0x1ba   : > { %v1018_v39 = vpop.f32.mrf.mxu1 }
 0x1bb   : > { %v692_v41 = vadd.f32 %v1018_v39, %v608_v35 }
 0x1bc   : > { %v683_v43 = vpop.f32.mrf.mxu1 }
 0x1bd   : > { %1067 = vtanh.f32 %v692_v41  ;;  %v684_v45 = vadd.f32 %v683_v43, %v598_v40 }
 0x1bf   : > { %1069 = vtanh.f32 %v684_v45 }
 0x1c0   : > { %1071 = vtanh.f32 %v681_v44 }
 0x1c6   : > { %v1066_v46 = vpop.eup %1065 }
 0x1ca   : > { %v1068_v47 = vpop.eup %1067 }
 0x1cb   : > { %v702_v48 = vpack.c.bf16 %v1068_v47, %v1066_v46 }
 0x1cc   : > { %v1070_v49 = vpop.eup %1069 }
 0x1cd   : > { %1020 = vmatpush3.bf16.msra.mxu0 %v702_v48  ;;  %v1072_v50 = vpop.eup %1071 }
 0x1ce   : > { %1021 = vmatprep.subr.bf16.mxu0 %v1100_v9  ;;  %v701_v51 = vpack.c.bf16 %v1070_v49, %v1072_v50 }
 0x1d1   : > { %1022 = vmatpush3.bf16.msra.mxu0 %v701_v51 }
 0x1d4   : > { %1024 = vmatmul.mubr.msk.bf16.vlgmr.msra.gmra.mxu0 %vm720_vm7, %v1064_v52 }
 0x294   : > { %v758_v54 = vpop.f32.mrf.mxu0 }
 0x295   : > { %v759_v55 = vadd.f32 %v758_v54, %v708_v53 }
 0x296   : > { %v1025_v56 = vpop.f32.mrf.mxu0 }
 0x297   : > { %v766_v57 = vmul.f32 1.442695, %v759_v55  ;;  %v772_v58 = vsel %vm720_vm7, %v759_v55, 0.0 }
 0x298   : > { %v773_v59 = vrot.slane %v772_v58, 4  ;;  %v761_v60 = vpop.f32.mrf.mxu0 }
 0x299   : > { %1073 = vpow2.f32 %v766_v57  ;;  %v762_v9 = vadd.f32 %v761_v60, %v713_v8 }
 0x29a   : > { %v774_v61 = vadd.f32 %v773_v59, %v772_v58  ;;  %v1026_v62 = vpop.f32.mrf.mxu0 }
 0x29c   : > { %v775_v63 = vrot.slane %v774_v61, 2 }
 0x29e   : > { %v776_v0 = vadd.f32 %v775_v63, %v774_v61 }
 0x2a0   : > { %v777_v1 = vrot.slane %v776_v0, 1 }
 0x2a2   : > { %v778_v3 = vadd.f32 %v777_v1, %v776_v0 }
 0x2a4   : > { %v779_v5 = vadd.f32 %v778_v3, %v771_v2 }
 0x2a6   : > { %v1074_v7 = vpop.eup %1073  ;;  %781 = vst.msk [vmem:[%s1287_s9] sm:$0x1] %vm780_vm9, %v779_v5 }
 0x2a7   : > { %v768_v10 = vmul.f32 %v1074_v7, %v571_v6 }
 0x2a9   : > { %v769_v11 = vadd.f32 %v768_v10, %v762_v9 }
 0x2ab   : > { %770 = vst.msk [vmem:[%s1286_s8 + $0x8] sm:$0xff] %vm720_vm7, %v769_v11 }
 0x2ac PF: > { %s20_s11 = sadd.s32 1, %s1097_s11   ;;  %s1290_s30 = smov %s1093_s10 }
 0x2ad   : > { %p17_p6 = scmp.ge.s32.totalorder %s20_s11, 4   ;;  %s1291_s10 = smov %s1293_s12 }
 0x2af   :  { %19 = sbr.rel (!%p17_p6) target bundleno = 2 (0x2), region = 119 }

// kernel: flow_aff_conv_act_forward.4
= control target key start
LH: loop header
LB: loop body
LE: loop exit
PB: predicated region body
PF: predicated region fallthrough
CT: control target
= control target key end

     0   :  { %s1247_s30 = smov 0   ;;  %s1249_s10 = smov 0   ;;  %s1409_s0 = inlined_call_operand.vmem [shape: f32[32,32], index: 0, kind: input, shape index: {}]   ;;  %s1410_s1 = inlined_call_operand.vmem [shape: bf16[32,32], index: 1, kind: input, shape index: {}]   ;;  %s1411_s2 = inlined_call_operand.vmem [shape: bf16[2,32,32], index: 2, kind: input, shape index: {}]   ;;  %s1412_s3 = inlined_call_operand.vmem [shape: f32[2,32,1], index: 3, kind: input, shape index: {}]   ;;  %s1413_s4 = inlined_call_operand.vmem [shape: bf16[2,32,48], index: 4, kind: input, shape index: {}]   ;;  %s1414_s5 = inlined_call_operand.vmem [shape: f32[2,32,1], index: 5, kind: input, shape index: {}]   ;;  %s1415_s6 = inlined_call_operand.vmem [shape: bf16[2,32,32], index: 6, kind: input, shape index: {}]   ;;  %s1416_s7 = inlined_call_operand.vmem [shape: f32[2,32,1], index: 7, kind: input, shape index: {}]   ;;  %s1417_s8 = inlined_call_operand.vmem [shape: f32[32,32], index: 8, kind: output, shape index: {0}]   ;;  %s1418_s9 = inlined_call_operand.vmem [shape: f32[1,32], index: 9, kind: output, shape index: {1}]  }
   0x1   :  { %s1251_s11 = smov 0  }
   0x2 LB: > { %s29_s12 = sadd.s32 1, %s1189_s10  ;;  %p1040_p0 = scmp.ge.s32.totalorder %s1193_s11, 1  ;;  %s1193_s11 = sphi %s1251_s11, %s20_s11   ;;  %s1189_s10 = sphi %s1249_s10, %s1420_s10   ;;  %s1185_s30 = sphi %s1247_s30, %s1419_s30  }
   0x3   : > { %p30_p1 = scmp.ge.s32.totalorder %s29_s12, 2  ;;  %p370_p2 = scmp.lt.s32.totalorder %s1193_s11, 3 }
   0x5   : > { %s1422_s12 = smov (%p30_p1, %s29_s12), 0  ;;  %p371_p3 = pnand %p1040_p0, %p370_p2 }
   0x6   : > { %p449_p4 = scmp.lt.s32.totalorder (!%p371_p3), %s1185_s30, 1  ;;  %p1053_p5 = scmp.ne.s32.totalorder (!%p371_p3), %s1185_s30, 0 }
   0x7   : > { %374 = sbr.rel (%p371_p3) target bundleno = 698 (0x2ba), region = 52 }
   0xc   : > { %s450_s13 = scalar_select %p449_p4, %s1185_s30, 1 }
   0xd   : > { %490 = sbr.rel (%p1053_p5) target bundleno = 24 (0x18), region = 56 }
   0xe   : > { %s1075_s14 = sshll.u32 %s450_s13, 4  ;;  %s1076_s15 = sshll.u32 %s450_s13, 5 }
   0xf   : > { %s1268_s18 = scalar_lea.vmem %s1411_s2, %s1075_s14  ;;  %s1273_s21 = scalar_lea.vmem %s1412_s3, %s1076_s15 }
  0x10   : > { %s1278_s24 = scalar_lea.vmem %s1413_s4, %s1075_s14  ;;  %s1283_s27 = scalar_lea.vmem %s1414_s5, %s1076_s15 }
  0x11   : > { %s1288_s13 = scalar_lea.vmem %s1415_s6, %s1075_s14  ;;  %s1293_s19 = scalar_lea.vmem %s1416_s7, %s1076_s15 }
  0x12   : > { %v491_v0 = vld [vmem:[%s1409_s0] sm:$0xff]  ;;  %vm495_vm0 = vcmask 261120   ;;  %v492_v1 = vld [vmem:[%s1409_s0 + $0x8] sm:$0xff]  ;;  %v493_v2 = vld [vmem:[%s1409_s0 + $0x10] sm:$0xff]  ;;  %vm500_vm1 = vcmask 253952   ;;  %v1195_v4 = vmov 0.0  }
  0x13   : > { %496 = vst.msk [vmem:[%s1417_s8] sm:$0xff] %vm495_vm0, %v491_v0  ;;  %497 = vst.msk [vmem:[%s1417_s8 + $0x8] sm:$0xff] %vm495_vm0, %v492_v1  ;;  %v494_v3 = vld [vmem:[%s1409_s0 + $0x18] sm:$0xff]  ;;  %v502_v5 = vld [vmem:[%s1410_s1] sm:$0xf]  ;;  %vm506_vm2 = vcmask 257024  }
  0x14   : > { %498 = vst.msk [vmem:[%s1417_s8 + $0x10] sm:$0xff] %vm495_vm0, %v493_v2  ;;  %v503_v6 = vld [vmem:[%s1410_s1 + $0x4] sm:$0xf]  ;;  %499 = vst.msk [vmem:[%s1417_s8 + $0x18] sm:$0xff] %vm495_vm0, %v494_v3  ;;  %v504_v7 = vld [vmem:[%s1410_s1 + $0x8] sm:$0xf] }
  0x15   : > { %501 = vst.msk [vmem:[%s1418_s9] sm:$0x1] %vm500_vm1, %v1195_v4  ;;  %v505_v8 = vld [vmem:[%s1410_s1 + $0xc] sm:$0xf] }
  0x16   : > { %507 = vst.msk [vmem:[#allocation2 + $0x8] sm:$0xf] %vm506_vm2, %v502_v5  ;;  %508 = vst.msk [vmem:[#allocation2 + $0xc] sm:$0xf] %vm506_vm2, %v503_v6 }
  0x17   : > { %509 = vst.msk [vmem:[#allocation2 + $0x10] sm:$0xf] %vm506_vm2, %v504_v7  ;;  %510 = vst.msk [vmem:[#allocation2 + $0x14] sm:$0xf] %vm506_vm2, %v505_v8 }
  0x18 PF: > { %vm555_vm3 = vcmask 261120   ;;  %v1196_v14 = vmov 0   ;;  %v1150_v16 = vld [vmem:[%s1268_s18] sm:$0xff]   ;;  %v634_v18 = vld [vmem:[%s1283_s27 + $0x10] sm:$0xff]  ;;  %v1151_v19 = vld [vmem:[%s1268_s18 + $0x8] sm:$0xff]   ;;  %vm684_vm4 = vcmask 392192  }
  0x19   : > { %1148 = vset.pattern.permute.xlu0 %v1196_v14  ;;  %1149 = vset.pattern.permute.xlu1 %v1196_v14  ;;  %v521_v17 = vld [vmem:[%s1273_s21] sm:$0xff]  ;;  %v522_v20 = vld [vmem:[%s1273_s21 + $0x8] sm:$0xff]  ;;  %v635_v21 = vld [vmem:[%s1283_s27 + $0x18] sm:$0xff]  ;;  %vm619_vm5 = vcmask 257024   ;;  %vm862_vm6 = vcmask 253952  }
  0x1a   : > { %v515_v11 = vld [vmem:[%s1417_s8] sm:$0xff]  ;;  %v516_v13 = vld [vmem:[%s1417_s8 + $0x8] sm:$0xff]  ;;  %1100 = vmatprep.mubr.msk.bf16.mxu0 %vm555_vm3, %v1150_v16  ;;  %527 = vperm.xlu0 %1148, %v521_v17   ;;  %v523_v26 = vld [vmem:[%s1273_s21 + $0x10] sm:$0xff] }
  0x1b   : > { %v517_v9 = vld [vmem:[%s1417_s8 + $0x10] sm:$0xff]  ;;  %v518_v10 = vld [vmem:[%s1417_s8 + $0x18] sm:$0xff]  ;;  %v519_v15 = vpack.c.bf16 %v516_v13, %v515_v11  ;;  %648 = vperm.xlu1 %1149, %v634_v18   ;;  %v632_v22 = vld [vmem:[%s1283_s27] sm:$0xff] }
  0x1c   : > { %v520_v12 = vpack.c.bf16 %v518_v10, %v517_v9  ;;  %v633_v23 = vld [vmem:[%s1283_s27 + $0x8] sm:$0xff]  ;;  %v750_v24 = vld [vmem:[%s1293_s19] sm:$0xff]  ;;  %v524_v27 = vld [vmem:[%s1273_s21 + $0x18] sm:$0xff] }
  0x1d   : > { %v751_v25 = vld [vmem:[%s1293_s19 + $0x8] sm:$0xff]  ;;  %v752_v28 = vld [vmem:[%s1293_s19 + $0x10] sm:$0xff]  ;;  %v1155_v31 = vld [vmem:[%s1278_s24] sm:$0xff]  }
  0x1e   : > { %1096 = vmatprep.subr.bf16.mxu0 %v520_v12  ;;  %532 = vperm.xlu0 %1148, %v522_v20   ;;  %v1152_v29 = vld [vmem:[#allocation2 + $0x10] sm:$0xff]   ;;  %v1153_v30 = vld [vmem:[#allocation2 + $0x8] sm:$0xff]   ;;  %v753_v32 = vld [vmem:[%s1293_s19 + $0x18] sm:$0xff] }
  0x1f   : > { %1097 = vmatpush3.bf16.msra.mxu0 %v520_v12  ;;  %653 = vperm.xlu1 %1149, %v635_v21   ;;  %v1156_v44 = vld [vmem:[%s1278_s24 + $0x8] sm:$0xff]   ;;  %v1157_v45 = vld [vmem:[%s1288_s13] sm:$0xff]  }
  0x20   : > { %1098 = vmatprep.subr.bf16.mxu0 %v519_v15  ;;  %1104 = vmatprep.subr.bf16.mxu1 %v1152_v29  ;;  %v1158_v0 = vld [vmem:[%s1288_s13 + $0x8] sm:$0xff]  }
  0x21   : > { %1105 = vmatpush3.bf16.msra.mxu1 %v1152_v29  ;;  %1110 = vmatprep.mubr.msk.bf16.mxu1 %vm684_vm4, %v1155_v31 }
  0x22   : > { %638 = vperm.xlu0 %1148, %v632_v22   ;;  %1106 = vmatprep.subr.bf16.mxu1 %v1153_v30 }
  0x23   : > { %1099 = vmatpush3.bf16.msra.mxu0 %v519_v15  ;;  %643 = vperm.xlu1 %1149, %v633_v23  }
  0x25   : > { %1107 = vmatpush3.bf16.msra.mxu1 %v1153_v30 }
  0x26   : > { %1101 = vmatmul.mubr.msk.bf16.vlgmr.msra.gmra.mxu0 %vm555_vm3, %v1151_v19  ;;  %756 = vperm.xlu0 %1148, %v750_v24  }
  0x27   : > { %761 = vperm.xlu1 %1149, %v751_v25   ;;  %1118 = vmatprep.mubr.msk.bf16.mxu0 %vm555_vm3, %v1157_v45 }
  0x2a   : > { %537 = vperm.xlu0 %1148, %v523_v26   ;;  %v851_v26 = vld [vmem:[%s1418_s9] sm:$0x1] }
  0x2b   : > { %542 = vperm.xlu1 %1149, %v524_v27  }
  0x2e   : > { %766 = vperm.xlu0 %1148, %v752_v28  }
  0x2f   : > { %771 = vperm.xlu1 %1149, %v753_v32  }
  0x95   : > { %v528_v33 = vpop.permute.xlu0 %527 }
  0x96   : > { %v649_v46 = vpop.permute.xlu1 %648 }
  0x99   : > { %v533_v39 = vpop.permute.xlu0 %532 }
  0x9a   : > { %v654_v47 = vpop.permute.xlu1 %653 }
  0x9d   : > { %v639_v51 = vpop.permute.xlu0 %638 }
  0x9e   : > { %v644_v55 = vpop.permute.xlu1 %643 }
  0xa1   : > { %v757_v2 = vpop.permute.xlu0 %756 }
  0xa2   : > { %v762_v7 = vpop.permute.xlu1 %761 }
  0xa5   : > { %v538_v15 = vpop.permute.xlu0 %537 }
  0xa6   : > { %v543_v22 = vpop.permute.xlu1 %542 }
  0xa9   : > { %v767_v21 = vpop.permute.xlu0 %766 }
  0xaa   : > { %v772_v31 = vpop.permute.xlu1 %771 }
  0xe6   : > { %v1364_v34 = vpop.f32.mrf.mxu0 }
  0xe7   : > { %v605_v19 = vadd.f32 %v1364_v34, %v538_v15 }
  0xe8   : > { %v596_v35 = vpop.f32.mrf.mxu0 }
  0xe9   : > { %v597_v36 = vadd.f32 %v596_v35, %v528_v33 }
  0xea   : > { %v1366_v37 = vpop.f32.mrf.mxu0 }
  0xeb   : > { %v1081_v38 = vpack.c.bf16 %v597_v36, %v597_v36  ;;  %839 = vst.msk [vmem:[%s1417_s8] sm:$0xff] %vm555_vm3, %v597_v36  ;;  %v608_v28 = vadd.f32 %v1366_v37, %v543_v22 }
  0xec   : > { %v599_v40 = vpop.f32.mrf.mxu0 }
  0xed   : > { %620 = vst.msk [vmem:[#allocation2] sm:$0xf] %vm619_vm5, %v1081_v38  ;;  %v600_v41 = vadd.f32 %v599_v40, %v533_v39 }
  0xef   : > { %v1082_v42 = vpack.c.bf16 %v600_v41, %v600_v41  ;;  %840 = vst.msk [vmem:[%s1417_s8 + $0x8] sm:$0xff] %vm555_vm3, %v600_v41 }
  0xf1   : > { %621 = vst.msk [vmem:[#allocation2 + $0x4] sm:$0xf] %vm619_vm5, %v1082_v42 }
  0xf8   : > { %v1154_v43 = vld [vmem:[#allocation2] sm:$0xff]  }
  0xf9   : > { %1108 = vmatprep.subr.bf16.mxu1 %v1154_v43 }
  0xfa   : > { %1109 = vmatpush3.bf16.msra.mxu1 %v1154_v43 }
  0xfd   : > { %1111 = vmatmul.mubr.msk.bf16.vlgmr.msra.gmra.mxu1 %vm684_vm4, %v1156_v44 }
 0x1bd   : > { %v1112_v48 = vpop.f32.mrf.mxu1 }
 0x1be   : > { %v734_v49 = vadd.f32 %v1112_v48, %v649_v46 }
 0x1bf   : > { %v725_v50 = vpop.f32.mrf.mxu1 }
 0x1c0   : > { %v726_v52 = vadd.f32 %v725_v50, %v639_v51  ;;  %1159 = vtanh.f32 %v734_v49 }
 0x1c1   : > { %v1113_v53 = vpop.f32.mrf.mxu1 }
 0x1c2   : > { %v737_v54 = vadd.f32 %v1113_v53, %v654_v47 }
 0x1c3   : > { %v728_v56 = vpop.f32.mrf.mxu1 }
 0x1c4   : > { %1161 = vtanh.f32 %v737_v54  ;;  %v729_v57 = vadd.f32 %v728_v56, %v644_v55 }
 0x1c5   : > { %1163 = vtanh.f32 %v726_v52 }
 0x1c6   : > { %1165 = vtanh.f32 %v729_v57 }
 0x1cd   : > { %v1160_v58 = vpop.eup %1159 }
 0x1d1   : > { %v1162_v59 = vpop.eup %1161 }
 0x1d2   : > { %v1164_v60 = vpop.eup %1163  ;;  %v749_v61 = vpack.c.bf16 %v1162_v59, %v1160_v58 }
 0x1d3   : > { %v1166_v62 = vpop.eup %1165 }
 0x1d4   : > { %1114 = vmatprep.subr.bf16.mxu0 %v749_v61  ;;  %v748_v63 = vpack.c.bf16 %v1166_v62, %v1164_v60 }
 0x1d5   : > { %1115 = vmatpush3.bf16.msra.mxu0 %v749_v61 }
 0x1d6   : > { %1116 = vmatprep.subr.bf16.mxu0 %v748_v63 }
 0x1d9   : > { %1117 = vmatpush3.bf16.msra.mxu0 %v748_v63 }
 0x1dc   : > { %1119 = vmatmul.mubr.msk.bf16.vlgmr.msra.gmra.mxu0 %vm555_vm3, %v1158_v0 }
 0x29c   : > { %v1120_v1 = vpop.f32.mrf.mxu0 }
 0x29d   : > { %v833_v24 = vadd.f32 %v1120_v1, %v767_v21 }
 0x29e   : > { %v824_v3 = vpop.f32.mrf.mxu0 }
 0x29f   : > { %v825_v4 = vadd.f32 %v824_v3, %v757_v2 }
 0x2a0   : > { %v1121_v5 = vpop.f32.mrf.mxu0 }
 0x2a1   : > { %v841_v6 = vmul.f32 1.442695, %v825_v4  ;;  %v852_v10 = vsel %vm555_vm3, %v825_v4, 0.0  ;;  %v836_v33 = vadd.f32 %v1121_v5, %v772_v31 }
 0x2a2   : > { %v827_v8 = vpop.f32.mrf.mxu0 }
 0x2a3   : > { %1167 = vpow2.f32 %v841_v6  ;;  %v828_v9 = vadd.f32 %v827_v8, %v762_v7 }
 0x2a5   : > { %v843_v11 = vmul.f32 1.442695, %v828_v9  ;;  %v853_v12 = vsel %vm555_vm3, %v828_v9, 0.0 }
 0x2a6   : > { %v854_v13 = vadd.f32 %v853_v12, %v852_v10 }
 0x2a7   : > { %1169 = vpow2.f32 %v843_v11 }
 0x2a8   : > { %v855_v14 = vrot.slane %v854_v13, 4 }
 0x2aa   : > { %v856_v16 = vadd.f32 %v855_v14, %v854_v13 }
 0x2ac   : > { %v857_v17 = vrot.slane %v856_v16, 2 }
 0x2ae   : > { %v858_v18 = vadd.f32 %v857_v17, %v856_v16 }
 0x2b0   : > { %v1168_v20 = vpop.eup %1167  ;;  %v859_v23 = vrot.slane %v858_v18, 1 }
 0x2b1   : > { %v845_v25 = vmul.f32 %v1168_v20, %v605_v19 }
 0x2b2   : > { %v860_v27 = vadd.f32 %v859_v23, %v858_v18 }
 0x2b3   : > { %v847_v29 = vadd.f32 %v845_v25, %v833_v24 }
 0x2b4   : > { %v1170_v30 = vpop.eup %1169  ;;  %v861_v32 = vadd.f32 %v860_v27, %v851_v26 }
 0x2b5   : > { %849 = vst.msk [vmem:[%s1417_s8 + $0x10] sm:$0xff] %vm555_vm3, %v847_v29  ;;  %v846_v34 = vmul.f32 %v1170_v30, %v608_v28 }
 0x2b6   : > { %863 = vst.msk [vmem:[%s1418_s9] sm:$0x1] %vm862_vm6, %v861_v32 }
 0x2b7   : > { %v848_v35 = vadd.f32 %v846_v34, %v836_v33 }
 0x2b9   : > { %850 = vst.msk [vmem:[%s1417_s8 + $0x18] sm:$0xff] %vm555_vm3, %v848_v35 }
 0x2ba PF: > { %s20_s11 = sadd.s32 1, %s1193_s11   ;;  %s1419_s30 = smov %s1189_s10 }
 0x2bb   : > { %p17_p6 = scmp.ge.s32.totalorder %s20_s11, 4   ;;  %s1420_s10 = smov %s1422_s12 }
 0x2bd   :  { %19 = sbr.rel (!%p17_p6) target bundleno = 2 (0x2), region = 119 }

</bundles_post_ra>
